<compile_context>
chip_gen: v6e
topology: v6e:2x2x1
jax: 0.10.0
libtpu: 0.0.40
codegen_flags: <defaults>
</compile_context>

<pallas_src>
import numpy as np
import jax
import jax.numpy as jnp
from jax.experimental import pallas as pl
from jax.experimental.pallas import tpu as pltpu

# ---------------- config (small, consistent with the module) ----------------
HIDDEN = 32
NUM_EXPERTS = 2
EXPERT_KERNEL_SIZES = (3, 5)
KMAX = max(EXPERT_KERNEL_SIZES)
KH = KMAX * HIDDEN                          # tap-major lane width of x tile (160)
KPH = ((KH + 127) // 128) * 128             # vreg-aligned GLU lane width (256)
INIT_RANGE = 0.02
BATCH = 2
SEQ = 16
LN_EPS = 1e-5
# Basic units (conv output rows) per grid step.  Fine at toy sizes; raise for
# production sequence lengths to amortize the ~0.35us per-grid-step overhead.
T_OUT = 256


def _output_pack_factor():
    """Output lane-packing factor: 8 on v6e/v7x (256-wide MXU), else 4."""
    try:
        kind = jax.devices()[0].device_kind.lower()
    except Exception:
        return 4
    return 8 if any(t in kind for t in ("v6", "v7", "tpu7")) else 4


PACK = _output_pack_factor()


def find_closest_factor(N, M):
    closest, best = None, float("inf")
    for d in range(1, int(N ** 0.5) + 1):
        if N % d == 0:
            for f in (d, N // d):
                diff = abs(f - M)
                if diff < best:
                    best, closest = diff, f
    return int(closest)


# ---------------- fused Pallas kernel (MxDNAConvNet, both experts) -----------
def conv_moe_kernel(x_ref, wab_ref, wc_ref, gamma_ref, beta_ref, wpost_ref,
                    o_ref):
    T = x_ref.shape[1]                        # basic units in this tile
    H = wc_ref.shape[2]                       # hidden
    kph = wc_ref.shape[1]                     # aligned tap-lane width (256)
    T4 = o_ref.shape[1]                       # T // PACK
    pack = T // T4

    x = x_ref[0]                              # (T, KMAX*H) bf16, taps on lanes

    # --- pointwise_conv_pre + GLU: ONE block-diagonal MXU dot for all taps ---
    ab = jnp.dot(x, wab_ref[0], preferred_element_type=jnp.float32)  # (T, 2*kph)
    glu = ab[:, :kph] * jax.nn.sigmoid(ab[:, kph:])   # f32; split is vreg-aligned

    # --- grouped conv (stride == kernel): taps already lane-major, one dot ---
    conv = jnp.dot(glu.astype(jnp.bfloat16), wc_ref[0],
                   preferred_element_type=jnp.float32)               # (T, H) f32

    # --- LayerNorm over hidden (f32) -----------------------------------------
    mean = jnp.mean(conv, axis=-1, keepdims=True)
    var = jnp.mean(jnp.square(conv - mean), axis=-1, keepdims=True)
    y = (conv - mean) * jax.lax.rsqrt(var + LN_EPS)
    y = y * gamma_ref[0] + beta_ref[0]

    # --- SiLU (f32, EUP) ------------------------------------------------------
    y = y * jax.nn.sigmoid(y)

    # --- pointwise_conv_post fused with the PACK-way output lane packing -----
    # one lane concat of contiguous row blocks, then a 128/256-wide dot whose
    # result is stored directly (unmasked lane-dense vst).
    yq = jnp.concatenate([y[q * T4:(q + 1) * T4, :] for q in range(pack)],
                         axis=-1)                                     # (T4, pack*H)
    out = jnp.dot(yq.astype(jnp.bfloat16), wpost_ref[0],
                  preferred_element_type=jnp.float32)                 # (T4, pack*H)
    o_ref[0] = out.astype(o_ref.dtype)


def experts_pallas(x_stacked, kp):
    """x_stacked: (E, t_total, KMAX*H) bf16 -> (E, t_total//PACK, PACK*H) bf16."""
    E, t_total, kh = x_stacked.shape
    H = HIDDEN
    T4 = T_OUT // PACK
    n_blocks = t_total // T_OUT
    return pl.pallas_call(
        conv_moe_kernel,
        out_shape=jax.ShapeDtypeStruct((E, n_blocks * T4, PACK * H), jnp.bfloat16),
        grid=(E, n_blocks),
        in_specs=[
            pl.BlockSpec((1, T_OUT, kh), lambda e, i: (e, i, 0)),        # unit rows
            pl.BlockSpec((1, kh, 2 * KPH), lambda e, i: (e, 0, 0)),      # block-diag wa|wb
            pl.BlockSpec((1, KPH, H), lambda e, i: (e, 0, 0)),           # stacked grouped conv
            pl.BlockSpec((1, 1, H), lambda e, i: (e, 0, 0)),             # LN gamma
            pl.BlockSpec((1, 1, H), lambda e, i: (e, 0, 0)),             # LN beta
            pl.BlockSpec((1, PACK * H, PACK * H), lambda e, i: (e, 0, 0)),  # block-diag wpost
        ],
        out_specs=pl.BlockSpec((1, T4, PACK * H), lambda e, i: (e, i, 0)),
        # Both axes independent.  Expert axis leads so per-expert weights are
        # fetched once per expert; on v7x the two TCs then split on the expert
        # axis, which is balanced here because both experts are padded to the
        # same number of tiles (see TODO above for the ragged case).
        compiler_params=pltpu.CompilerParams(
            dimension_semantics=("parallel", "parallel")),
    )(x_stacked, kp["wab"], kp["wc"], kp["gamma"], kp["beta"], kp["wpost"])


# ---------------- MoE block forward ------------------------------------------
def moe_forward(hidden_states, router_logits, center_mask, all_mask, kp):
    B, S, H = hidden_states.shape
    N = B * S
    router_w = jax.nn.softmax(router_logits, axis=-1).reshape(N, NUM_EXPERTS)
    x_flat = hidden_states.reshape(N, H)
    all_flat = all_mask.reshape(N)
    center_flat = center_mask.reshape(N)

    # common (static) number of basic-unit rows per expert (worst-case padded)
    t_total = T_OUT * max(-(-N // (T_OUT * k)) for k in EXPERT_KERNEL_SIZES)

    xs, perms, centers, n_units = [], [], [], []
    for e, k in enumerate(EXPERT_KERNEL_SIZES):
        mask_e = all_flat == e
        # unpad_input: this expert's tokens first, original order preserved
        perm = jnp.argsort(jnp.where(mask_e, 0, 1), stable=True)
        gathered = x_flat[perm]
        perms.append(perm)
        centers.append((center_flat[perm] == e) & mask_e[perm])
        # NOTE: matches the PyTorch module: Conv1d(stride=k) silently drops a
        # remainder if the expert's token count is not an exact multiple of k.
        n_units.append(jnp.sum(mask_e.astype(jnp.int32)) // k)
        # group k consecutive tokens into one basic-unit row (pure reshape,
        # no activation transpose), then zero-pad the tap axis up to KMAX
        xg = jnp.pad(gathered, ((0, t_total * k - N), (0, 0)))
        xg = xg.reshape(t_total, k * H)
        xg = jnp.pad(xg, ((0, 0), (0, (KMAX - k) * H)))
        xs.append(xg)
    x_stacked = jnp.stack(xs, axis=0).astype(jnp.bfloat16)   # (E, t_total, KMAX*H)

    out_wide = experts_pallas(x_stacked, kp)                 # (E, t_total//PACK, PACK*H)
    # undo the lane packing: lane block q of output row (i, r) is unit
    # i*T_OUT + q*(T_OUT//PACK) + r  ->  (E, t_total, H) unit-major rows
    n_blocks, T4 = t_total // T_OUT, T_OUT // PACK
    out_units = out_wide.astype(jnp.float32).reshape(
        NUM_EXPERTS, n_blocks, T4, PACK, H)
    out_units = jnp.transpose(out_units, (0, 1, 3, 2, 4)).reshape(
        NUM_EXPERTS, t_total, H)

    final = jnp.zeros_like(x_flat)
    for e, k in enumerate(EXPERT_KERNEL_SIZES):
        expert_out = out_units[e]
        # zero garbage/pad units (never selected below, but keep it robust)
        expert_out = jnp.where(
            jnp.arange(t_total)[:, None] < n_units[e], expert_out, 0.0)
        center_g = centers[e]
        # j-th expert output row -> j-th center token (in unpad order)
        cj = jnp.clip(jnp.cumsum(center_g.astype(jnp.int32)) - 1, 0, t_total - 1)
        contrib_g = jnp.where(center_g[:, None], expert_out[cj], 0.0)
        contrib = jnp.zeros_like(x_flat).at[perms[e]].set(contrib_g)  # pad_input
        final = final + contrib * router_w[:, e:e + 1]
    return final.reshape(B, S, H)


# ---------------- deterministic parameter init --------------------------------
def init_params(seed=0):
    key = jax.random.PRNGKey(seed)
    raw = []
    H = HIDDEN
    for e, k in enumerate(EXPERT_KERNEL_SIZES):
        key, k1, k2, k3 = jax.random.split(key, 4)
        G = find_closest_factor(H, k)
        Cg = H // G
        w_pre = jax.random.normal(k1, (2 * H, H), jnp.float32) * 0.1   # Linear(H,2H)
        w_conv = jnp.clip(                                             # ~trunc_normal
            jax.random.normal(k2, (H, Cg, k), jnp.float32) * INIT_RANGE,
            -2 * INIT_RANGE, 2 * INIT_RANGE)
        gamma = jnp.ones((H,), jnp.float32)
        beta = jnp.zeros((H,), jnp.float32)
        w_post = jax.random.normal(k3, (H, H), jnp.float32) * 0.1      # Linear(H,H)
        raw.append(dict(groups=G, kernel_size=k, w_pre=w_pre, w_conv=w_conv,
                        gamma=gamma, beta=beta, w_post=w_post))
    return raw


def pack_kernel_params(raw):
    """Per-expert weights stacked on a leading expert axis; taps / output-pack
    groups folded into block-diagonal lane-axis weights; bf16 for the MXU."""
    H = HIDDEN
    wab_l, wc_l, gamma_l, beta_l, wpost_l = [], [], [], [], []
    for p in raw:
        k, G = p["kernel_size"], p["groups"]
        Cg = H // G
        w_pre_t = np.asarray(p["w_pre"], np.float32).T            # (H, 2H): [:H]=a, [H:]=b
        # block-diagonal fused pre weight: tap j of 'a' -> cols [j*H,(j+1)*H),
        # tap j of 'b' -> cols [KPH+j*H, ...).  Cols [k*H, KPH) stay zero so
        # the GLU halves split on a 256-lane (vreg-aligned) boundary.
        wab = np.zeros((KH, 2 * KPH), np.float32)
        for j in range(k):
            wab[j * H:(j + 1) * H, j * H:(j + 1) * H] = w_pre_t[:, :H]
            wab[j * H:(j + 1) * H, KPH + j * H:KPH + (j + 1) * H] = w_pre_t[:, H:]
        # stacked grouped-conv weight (densified across groups):
        #   wc[j*H + c, o] = w_conv[o, c - g_o*Cg, j]  if c in group(o) else 0
        w_conv = np.asarray(p["w_conv"], np.float32)               # (H, Cg, k)
        wc = np.zeros((KPH, H), np.float32)
        for o in range(H):
            g = o // Cg
            for j in range(k):
                wc[j * H + g * Cg:j * H + (g + 1) * Cg, o] = w_conv[o, :, j]
        # PACK-replicated block-diagonal post weight (folds output packing
        # into the post matmul).
        w_post_t = np.asarray(p["w_post"], np.float32).T           # (H, H)
        wpost = np.zeros((PACK * H, PACK * H), np.float32)
        for q in range(PACK):
            wpost[q * H:(q + 1) * H, q * H:(q + 1) * H] = w_post_t
        wab_l.append(wab)
        wc_l.append(wc)
        gamma_l.append(np.asarray(p["gamma"]).reshape(1, H))
        beta_l.append(np.asarray(p["beta"]).reshape(1, H))
        wpost_l.append(wpost)
    return dict(
        wab=jnp.asarray(np.stack(wab_l)).astype(jnp.bfloat16),
        wc=jnp.asarray(np.stack(wc_l)).astype(jnp.bfloat16),
        gamma=jnp.asarray(np.stack(gamma_l)),
        beta=jnp.asarray(np.stack(beta_l)),
        wpost=jnp.asarray(np.stack(wpost_l)).astype(jnp.bfloat16),
    )


# ---------------- numpy reference (faithful f32 port of the PyTorch code) ----
def reference_forward(hs, logits, center, allm, params):
    hs, logits = np.asarray(hs, np.float32), np.asarray(logits, np.float32)
    center, allm = np.asarray(center), np.asarray(allm)
    B, S, H = hs.shape
    e_l = np.exp(logits - logits.max(-1, keepdims=True))
    rw = e_l / e_l.sum(-1, keepdims=True)
    final = np.zeros_like(hs)
    sig = lambda z: 1.0 / (1.0 + np.exp(-z))
    for e, k in enumerate(EXPERT_KERNEL_SIZES):
        p = params[e]
        idx = np.nonzero((allm == e).reshape(-1))[0]
        if idx.size == 0:
            continue
        x_unpad = hs.reshape(-1, H)[idx]
        c_unpad = center.reshape(-1)[idx]
        y = x_unpad @ np.asarray(p["w_pre"]).T
        a, b = y[:, :H], y[:, H:]
        g = a * sig(b)
        G, Cg = p["groups"], H // p["groups"]
        n_out = x_unpad.shape[0] // k
        conv = np.zeros((n_out, H), np.float32)
        wcv = np.asarray(p["w_conv"])
        for t in range(n_out):
            for o in range(H):
                grp = o // Cg
                window = g[t * k:(t + 1) * k, grp * Cg:(grp + 1) * Cg]   # (k, Cg)
                conv[t, o] = np.sum(wcv[o].T * window)
        mean = conv.mean(-1, keepdims=True)
        var = ((conv - mean) ** 2).mean(-1, keepdims=True)
        ln = ((conv - mean) / np.sqrt(var + LN_EPS) * np.asarray(p["gamma"])
              + np.asarray(p["beta"]))
        sw = ln * sig(ln)
        out = sw @ np.asarray(p["w_post"]).T
        fh_unpad = np.zeros_like(x_unpad)
        fh_unpad[c_unpad == e] = out
        padded = np.zeros((B * S, H), np.float32)
        padded[idx] = fh_unpad
        final += padded.reshape(B, S, H) * rw[:, :, e:e + 1]
    return final


# ---------------- main --------------------------------------------------------
if __name__ == "__main__":
    key = jax.random.PRNGKey(0)
    k_h, k_r = jax.random.split(key)
    hidden_states = jax.random.normal(k_h, (BATCH, SEQ, HIDDEN), jnp.float32)
    router_logits = jax.random.normal(k_r, (BATCH, SEQ, NUM_EXPERTS), jnp.float32)

    # basic units: contiguous runs of k_e tokens assigned to expert e, one center each
    all_mask = np.array([
        [0, 0, 0, 1, 1, 1, 1, 1, 0, 0, 0, 1, 1, 1, 1, 1],
        [1, 1, 1, 1, 1, 0, 0, 0, 1, 1, 1, 1, 1, 0, 0, 0],
    ], dtype=np.int32)
    center_mask = np.array([
        [-1, 0, -1, -1, -1, 1, -1, -1, -1, 0, -1, -1, -1, 1, -1, -1],
        [-1, -1, 1, -1, -1, -1, 0, -1, -1, -1, 1, -1, -1, -1, 0, -1],
    ], dtype=np.int32)

    raw_params = init_params(0)
    kernel_params = pack_kernel_params(raw_params)

    fwd = jax.jit(moe_forward)
    out = fwd(hidden_states, router_logits, jnp.asarray(center_mask),
              jnp.asarray(all_mask), kernel_params)
    out = jax.block_until_ready(out)

    ref = reference_forward(hidden_states, router_logits, center_mask,
                            all_mask, raw_params)
    # tolerance accounts for bf16 MXU operands and bf16 kernel output
    # (accumulation / LayerNorm / GLU / SiLU remain f32)
    np.testing.assert_allclose(np.asarray(out), ref, rtol=5e-2, atol=3e-2)

    print("KERNEL_OK")
</pallas_src>

<mosaic_0001>
module attributes {stable_mosaic.version = 11 : i64} {
  func.func @conv_moe_kernel(%arg0: i32, %arg1: i32, %arg2: memref<1x256x160xbf16, #tpu.memory_space<vmem>>, %arg3: memref<1x160x512xbf16, #tpu.memory_space<vmem>>, %arg4: memref<1x256x32xbf16, #tpu.memory_space<vmem>>, %arg5: memref<1x1x32xf32, #tpu.memory_space<vmem>>, %arg6: memref<1x1x32xf32, #tpu.memory_space<vmem>>, %arg7: memref<1x128x128xbf16, #tpu.memory_space<vmem>>, %arg8: memref<1x64x128xbf16, #tpu.memory_space<vmem>>) attributes {dimension_semantics = [#tpu.dimension_semantics<parallel>, #tpu.dimension_semantics<parallel>], iteration_bounds = array<i64: 2, 1>, scalar_prefetch = 0 : i64, scratch_operands = 0 : i64, tpu.core_type = #tpu.core_type<tc>, window_params = [{transform_indices = @transform_0, window_bounds = array<i64: 1, 256, 160>}, {transform_indices = @transform_1, window_bounds = array<i64: 1, 160, 512>}, {transform_indices = @transform_2, window_bounds = array<i64: 1, 256, 32>}, {transform_indices = @transform_3, window_bounds = array<i64: 1, 1, 32>}, {transform_indices = @transform_4, window_bounds = array<i64: 1, 1, 32>}, {transform_indices = @transform_5, window_bounds = array<i64: 1, 128, 128>}, {transform_indices = @transform_6, window_bounds = array<i64: 1, 64, 128>}]} {
    %c0 = arith.constant 0 : index
    %c0_0 = arith.constant 0 : index
    %c0_1 = arith.constant 0 : index
    %0 = vector.load %arg2[%c0, %c0_0, %c0_1] : memref<1x256x160xbf16, #tpu.memory_space<vmem>>, vector<1x256x160xbf16>
    %1 = vector.shape_cast %0 : vector<1x256x160xbf16> to vector<256x160xbf16>
    %c0_2 = arith.constant 0 : index
    %c0_3 = arith.constant 0 : index
    %c0_4 = arith.constant 0 : index
    %2 = vector.load %arg3[%c0_2, %c0_3, %c0_4] : memref<1x160x512xbf16, #tpu.memory_space<vmem>>, vector<1x160x512xbf16>
    %3 = vector.shape_cast %2 : vector<1x160x512xbf16> to vector<160x512xbf16>
    %cst = arith.constant dense<0.000000e+00> : vector<256x512xf32>
    %4 = tpu.matmul %1, %3, %cst {dimension_numbers = #tpu.dot_dimension_numbers<[1], [0], [0], [1], [0, 0, 1, 1], [], []>} : vector<256x160xbf16>, vector<160x512xbf16>, vector<256x512xf32> -> vector<256x512xf32>
    %5 = vector.extract_strided_slice %4 {offsets = [0, 0], sizes = [256, 256], strides = [1, 1]} : vector<256x512xf32> to vector<256x256xf32>
    %6 = vector.extract_strided_slice %4 {offsets = [0, 256], sizes = [256, 256], strides = [1, 1]} : vector<256x512xf32> to vector<256x256xf32>
    %7 = arith.negf %6 : vector<256x256xf32>
    %8 = math.exp %7 : vector<256x256xf32>
    %cst_5 = arith.constant 1.000000e+00 : f32
    %9 = vector.broadcast %cst_5 : f32 to vector<256x256xf32>
    %10 = arith.addf %9, %8 : vector<256x256xf32>
    %11 = arith.divf %9, %10 : vector<256x256xf32>
    %12 = arith.mulf %5, %11 : vector<256x256xf32>
    %13 = arith.truncf %12 : vector<256x256xf32> to vector<256x256xbf16>
    %c0_6 = arith.constant 0 : index
    %c0_7 = arith.constant 0 : index
    %c0_8 = arith.constant 0 : index
    %14 = vector.load %arg4[%c0_6, %c0_7, %c0_8] : memref<1x256x32xbf16, #tpu.memory_space<vmem>>, vector<1x256x32xbf16>
    %15 = vector.shape_cast %14 : vector<1x256x32xbf16> to vector<256x32xbf16>
    %cst_9 = arith.constant dense<0.000000e+00> : vector<256x32xf32>
    %16 = tpu.matmul %13, %15, %cst_9 {dimension_numbers = #tpu.dot_dimension_numbers<[1], [0], [0], [1], [0, 0, 1, 1], [], []>} : vector<256x256xbf16>, vector<256x32xbf16>, vector<256x32xf32> -> vector<256x32xf32>
    %cst_10 = arith.constant dense<0.000000e+00> : vector<256xf32>
    %17 = vector.multi_reduction <add>, %16, %cst_10 [1] : vector<256x32xf32> to vector<256xf32>
    %18 = vector.shape_cast %17 : vector<256xf32> to vector<256x1xf32>
    %cst_11 = arith.constant 3.200000e+01 : f32
    %19 = vector.broadcast %cst_11 : f32 to vector<256x1xf32>
    %20 = arith.divf %18, %19 : vector<256x1xf32>
    %21 = vector.broadcast %20 : vector<256x1xf32> to vector<256x32xf32>
    %22 = arith.subf %16, %21 : vector<256x32xf32>
    %23 = arith.mulf %22, %22 : vector<256x32xf32>
    %cst_12 = arith.constant dense<0.000000e+00> : vector<256xf32>
    %24 = vector.multi_reduction <add>, %23, %cst_12 [1] : vector<256x32xf32> to vector<256xf32>
    %25 = vector.shape_cast %24 : vector<256xf32> to vector<256x1xf32>
    %cst_13 = arith.constant 3.200000e+01 : f32
    %26 = vector.broadcast %cst_13 : f32 to vector<256x1xf32>
    %27 = arith.divf %25, %26 : vector<256x1xf32>
    %28 = vector.broadcast %20 : vector<256x1xf32> to vector<256x32xf32>
    %29 = arith.subf %16, %28 : vector<256x32xf32>
    %cst_14 = arith.constant 9.99999974E-6 : f32
    %30 = vector.broadcast %cst_14 : f32 to vector<256x1xf32>
    %31 = arith.addf %27, %30 : vector<256x1xf32>
    %32 = math.rsqrt %31 : vector<256x1xf32>
    %33 = vector.broadcast %32 : vector<256x1xf32> to vector<256x32xf32>
    %34 = arith.mulf %29, %33 : vector<256x32xf32>
    %c0_15 = arith.constant 0 : index
    %c0_16 = arith.constant 0 : index
    %c0_17 = arith.constant 0 : index
    %35 = vector.load %arg5[%c0_15, %c0_16, %c0_17] : memref<1x1x32xf32, #tpu.memory_space<vmem>>, vector<1x1x32xf32>
    %36 = vector.shape_cast %35 : vector<1x1x32xf32> to vector<1x32xf32>
    %37 = vector.broadcast %36 : vector<1x32xf32> to vector<256x32xf32>
    %38 = arith.mulf %34, %37 : vector<256x32xf32>
    %c0_18 = arith.constant 0 : index
    %c0_19 = arith.constant 0 : index
    %c0_20 = arith.constant 0 : index
    %39 = vector.load %arg6[%c0_18, %c0_19, %c0_20] : memref<1x1x32xf32, #tpu.memory_space<vmem>>, vector<1x1x32xf32>
    %40 = vector.shape_cast %39 : vector<1x1x32xf32> to vector<1x32xf32>
    %41 = vector.broadcast %40 : vector<1x32xf32> to vector<256x32xf32>
    %42 = arith.addf %38, %41 : vector<256x32xf32>
    %43 = arith.negf %42 : vector<256x32xf32>
    %44 = math.exp %43 : vector<256x32xf32>
    %cst_21 = arith.constant 1.000000e+00 : f32
    %45 = vector.broadcast %cst_21 : f32 to vector<256x32xf32>
    %46 = arith.addf %45, %44 : vector<256x32xf32>
    %47 = arith.divf %45, %46 : vector<256x32xf32>
    %48 = arith.mulf %42, %47 : vector<256x32xf32>
    %49 = vector.extract_strided_slice %48 {offsets = [0, 0], sizes = [64, 32], strides = [1, 1]} : vector<256x32xf32> to vector<64x32xf32>
    %50 = vector.extract_strided_slice %48 {offsets = [64, 0], sizes = [64, 32], strides = [1, 1]} : vector<256x32xf32> to vector<64x32xf32>
    %51 = vector.extract_strided_slice %48 {offsets = [128, 0], sizes = [64, 32], strides = [1, 1]} : vector<256x32xf32> to vector<64x32xf32>
    %52 = vector.extract_strided_slice %48 {offsets = [192, 0], sizes = [64, 32], strides = [1, 1]} : vector<256x32xf32> to vector<64x32xf32>
    %53 = tpu.concatenate %49, %50, %51, %52 in 1 : vector<64x32xf32>, vector<64x32xf32>, vector<64x32xf32>, vector<64x32xf32> -> vector<64x128xf32>
    %54 = arith.truncf %53 : vector<64x128xf32> to vector<64x128xbf16>
    %c0_22 = arith.constant 0 : index
    %c0_23 = arith.constant 0 : index
    %c0_24 = arith.constant 0 : index
    %55 = vector.load %arg7[%c0_22, %c0_23, %c0_24] : memref<1x128x128xbf16, #tpu.memory_space<vmem>>, vector<1x128x128xbf16>
    %56 = vector.shape_cast %55 : vector<1x128x128xbf16> to vector<128x128xbf16>
    %cst_25 = arith.constant dense<0.000000e+00> : vector<64x128xf32>
    %57 = tpu.matmul %54, %56, %cst_25 {dimension_numbers = #tpu.dot_dimension_numbers<[1], [0], [0], [1], [0, 0, 1, 1], [], []>} : vector<64x128xbf16>, vector<128x128xbf16>, vector<64x128xf32> -> vector<64x128xf32>
    %58 = arith.truncf %57 : vector<64x128xf32> to vector<64x128xbf16>
    %c0_26 = arith.constant 0 : index
    %c0_27 = arith.constant 0 : index
    %c0_28 = arith.constant 0 : index
    %59 = vector.load %arg8[%c0_26, %c0_27, %c0_28] : memref<1x64x128xbf16, #tpu.memory_space<vmem>>, vector<1x64x128xbf16>
    %60 = vector.shape_cast %59 : vector<1x64x128xbf16> to vector<64x128xbf16>
    %61 = vector.shape_cast %58 : vector<64x128xbf16> to vector<1x64x128xbf16>
    tpu.vector_store %arg8[%c0_26, %c0_27, %c0_28], %61 {strides = array<i32>} : memref<1x64x128xbf16, #tpu.memory_space<vmem>>, vector<1x64x128xbf16>,
    return
  }
  func.func @transform_0(%arg0: i32, %arg1: i32) -> (i32, i32, i32) {
    %c0_i32 = arith.constant 0 : i32
    %c0_i32_0 = arith.constant 0 : i32
    return %arg0, %arg1, %c0_i32 : i32, i32, i32
  }
  func.func @transform_1(%arg0: i32, %arg1: i32) -> (i32, i32, i32) {
    %c0_i32 = arith.constant 0 : i32
    %c0_i32_0 = arith.constant 0 : i32
    %c0_i32_1 = arith.constant 0 : i32
    return %arg0, %c0_i32, %c0_i32_0 : i32, i32, i32
  }
  func.func @transform_2(%arg0: i32, %arg1: i32) -> (i32, i32, i32) {
    %c0_i32 = arith.constant 0 : i32
    %c0_i32_0 = arith.constant 0 : i32
    %c0_i32_1 = arith.constant 0 : i32
    return %arg0, %c0_i32, %c0_i32_0 : i32, i32, i32
  }
  func.func @transform_3(%arg0: i32, %arg1: i32) -> (i32, i32, i32) {
    %c0_i32 = arith.constant 0 : i32
    %c0_i32_0 = arith.constant 0 : i32
    %c0_i32_1 = arith.constant 0 : i32
    return %arg0, %c0_i32, %c0_i32_0 : i32, i32, i32
  }
  func.func @transform_4(%arg0: i32, %arg1: i32) -> (i32, i32, i32) {
    %c0_i32 = arith.constant 0 : i32
    %c0_i32_0 = arith.constant 0 : i32
    %c0_i32_1 = arith.constant 0 : i32
    return %arg0, %c0_i32, %c0_i32_0 : i32, i32, i32
  }
  func.func @transform_5(%arg0: i32, %arg1: i32) -> (i32, i32, i32) {
    %c0_i32 = arith.constant 0 : i32
    %c0_i32_0 = arith.constant 0 : i32
    %c0_i32_1 = arith.constant 0 : i32
    return %arg0, %c0_i32, %c0_i32_0 : i32, i32, i32
  }
  func.func @transform_6(%arg0: i32, %arg1: i32) -> (i32, i32, i32) {
    %c0_i32 = arith.constant 0 : i32
    %c0_i32_0 = arith.constant 0 : i32
    return %arg0, %arg1, %c0_i32 : i32, i32, i32
  }
}

</mosaic_0001>

<bundles_post_ra>
// kernel: moe_forward.1
= control target key start
LH: loop header
LB: loop body
LE: loop exit
PB: predicated region body
PF: predicated region fallthrough
CT: control target
= control target key end

     0   :  { %s4344_s21 = smov 0   ;;  %s4346_s22 = smov 0   ;;  %s5386_s0 = inlined_call_operand.vmem [shape: bf16[2,256,160], index: 0, kind: input, shape index: {}]   ;;  %s5387_s1 = inlined_call_operand.vmem [shape: bf16[2,160,512], index: 1, kind: input, shape index: {}]   ;;  %s5388_s2 = inlined_call_operand.vmem [shape: bf16[2,256,32], index: 2, kind: input, shape index: {}]   ;;  %s5389_s3 = inlined_call_operand.vmem [shape: f32[2,1,32], index: 3, kind: input, shape index: {}]   ;;  %s5390_s4 = inlined_call_operand.vmem [shape: f32[2,1,32], index: 4, kind: input, shape index: {}]   ;;  %s5391_s5 = inlined_call_operand.vmem [shape: bf16[2,128,128], index: 5, kind: input, shape index: {}]   ;;  %s5392_s6 = inlined_call_operand.vmem [shape: bf16[2,64,128], index: 6, kind: output, shape index: {}]  }
   0x1   :  { %s4348_s23 = smov 0  }
   0x2 LB: > { %s28_s24 = sadd.s32 1, %s4300_s22  ;;  %p3165_p0 = scmp.ge.s32.totalorder %s4304_s23, 1  ;;  %s4304_s23 = sphi %s4348_s23, %s16_s23   ;;  %s4300_s22 = sphi %s4346_s22, %s5404_s22   ;;  %s4296_s21 = sphi %s4344_s21, %s5403_s21  }
   0x3   : > { %p30_p1 = scmp.ge.s32.totalorder %s28_s24, 2  ;;  %p280_p2 = scmp.lt.s32.totalorder %s4304_s23, 3 }
   0x5   : > { %s5406_s24 = smov (%p30_p1, %s28_s24), 0  ;;  %p281_p3 = pnand %p3165_p0, %p280_p2 }
   0x7   : > { %284 = sbr.rel (%p281_p3) target bundleno = 1339 (0x53b), region = 44 }
   0xc   : > { %p341_p4 = scmp.lt.s32.totalorder %s4296_s21, 1  ;;  %vm799_vm0 = vcmask 261120   ;;  %s4306_s27 = smov 32   ;;  %vm2826_vm1 = vcmask 523264   ;;  %vm2835_vm2 = vcmask 785408  }
   0xd   : > { %s4307_s28 = smov 64  }
   0xe   : > { %s5408_s21 = smov (!%p341_p4, %s4296_s21), 1 }
   0xf   : > { %s3614_s25 = smul.u32 320, %s5408_s21  ;;  %s3411_s26 = sshll.u32 %s5408_s21, 8 }
  0x10   : > { %s4369_s29 = scalar_lea.vmem %s5386_s0, %s3411_s26  ;;  %s3412_s9 = sshll.u32 %s5408_s21, 7 }
  0x11   : > { %s4374_s8 = scalar_lea.vmem %s5387_s1, %s3614_s25  ;;  %v4386_v9 = vld [vmem:[%s4369_s29 + $0x94] ss:$8 sps:$4 sm:$0xff]   ;;  %v4403_v22 = vld [vmem:[%s4369_s29 + $0x4] ss:$8 sps:$4 sm:$0xff]   ;;  %v4406_v23 = vld [vmem:[%s4369_s29 + $0x90] ss:$8 sps:$4 sm:$0xff]   ;;  %s4544_s12 = scalar_lea.vmem %s5388_s2, %s3412_s9 }
  0x12   : > { %v3702_v0 = vld [vmem:[%s4374_s8 + $0xe4] ss:$16 sps:$4 sm:$0xff]   ;;  %v3704_v1 = vld [vmem:[%s4374_s8 + $0xe0] ss:$16 sps:$4 sm:$0xff]   ;;  %3256 = vmatprep.mubr.msk.bf16.mxu1 %vm799_vm0, %v4386_v9  ;;  %v3737_v21 = vld [vmem:[%s4374_s8 + $0xec] ss:$16 sps:$4 sm:$0xff]   ;;  %3247 = vmatprep.mubr.msk.bf16.mxu0 %vm799_vm0, %v4403_v22  ;;  %s363_s19 = scalar_lea.vmem %s5389_s3, %s5408_s21  ;;  %s366_s26 = scalar_lea.vmem %s5390_s4, %s5408_s21 }
  0x13   : > { %3594 = vmatprep.subr.bf16.mxu1 %v3702_v0  ;;  %v3705_v2 = vld [vmem:[%s4374_s8 + $0xc4] ss:$16 sps:$4 sm:$0xff]   ;;  %848 = vmatprep.subr.bf16.mxu0 %v3702_v0  ;;  %v3707_v3 = vld [vmem:[%s4374_s8 + $0xc0] ss:$16 sps:$4 sm:$0xff]   ;;  %v3735_v24 = vld [vmem:[%s4374_s8 + $0xe8] ss:$16 sps:$4 sm:$0xff]  }
  0x14   : > { %3604 = vmatpush1.bf16.msra.mxu1 %v3704_v1  ;;  %849 = vmatpush1.bf16.msra.mxu0 %v3704_v1  ;;  %v3708_v4 = vld [vmem:[%s4374_s8 + $0xa4] ss:$16 sps:$4 sm:$0xff]   ;;  %v3710_v5 = vld [vmem:[%s4374_s8 + $0xa0] ss:$16 sps:$4 sm:$0xff]   ;;  %v3740_v26 = vld [vmem:[%s4374_s8 + $0xcc] ss:$16 sps:$4 sm:$0xff]  }
  0x15   : > { %3595 = vmatprep.subr.bf16.mxu1 %v3705_v2  ;;  %850 = vmatprep.subr.bf16.mxu0 %v3705_v2  ;;  %v3711_v6 = vld [vmem:[%s4374_s8 + $0x84] ss:$16 sps:$4 sm:$0xff]   ;;  %v3713_v7 = vld [vmem:[%s4374_s8 + $0x80] ss:$16 sps:$4 sm:$0xff]   ;;  %v3738_v27 = vld [vmem:[%s4374_s8 + $0xc8] ss:$16 sps:$4 sm:$0xff]  }
  0x16   : > { %v3714_v8 = vld [vmem:[%s4374_s8 + $0x64] ss:$16 sps:$4 sm:$0xff]   ;;  %v3716_v10 = vld [vmem:[%s4374_s8 + $0x60] ss:$16 sps:$4 sm:$0xff]   ;;  %v3746_v30 = vld [vmem:[%s4374_s8 + $0xac] ss:$16 sps:$4 sm:$0xff]  }
  0x17   : > { %v3717_v11 = vld [vmem:[%s4374_s8 + $0x44] ss:$16 sps:$4 sm:$0xff]   ;;  %v3719_v12 = vld [vmem:[%s4374_s8 + $0x40] ss:$16 sps:$4 sm:$0xff]   ;;  %v3744_v32 = vld [vmem:[%s4374_s8 + $0xa8] ss:$16 sps:$4 sm:$0xff]  }
  0x18   : > { %3605 = vmatpush1.bf16.msra.mxu1 %v3707_v3  ;;  %851 = vmatpush1.bf16.msra.mxu0 %v3707_v3  ;;  %v3720_v13 = vld [vmem:[%s4374_s8 + $0x24] ss:$16 sps:$4 sm:$0xff]   ;;  %v3722_v14 = vld [vmem:[%s4374_s8 + $0x20] ss:$16 sps:$4 sm:$0xff]   ;;  %v3752_v34 = vld [vmem:[%s4374_s8 + $0x8c] ss:$16 sps:$4 sm:$0xff]  }
  0x19   : > { %3596 = vmatprep.subr.bf16.mxu1 %v3708_v4  ;;  %852 = vmatprep.subr.bf16.mxu0 %v3708_v4  ;;  %v3723_v15 = vld [vmem:[%s4374_s8 + $0x4] ss:$16 sps:$4 sm:$0xff]   ;;  %v3725_v16 = vld [vmem:[%s4374_s8] ss:$16 sps:$4 sm:$0xff]   ;;  %v3750_v36 = vld [vmem:[%s4374_s8 + $0x88] ss:$16 sps:$4 sm:$0xff]  }
  0x1a   : > { %v3726_v17 = vld [vmem:[%s4374_s8 + $0x124] ss:$16 sps:$4 sm:$0xff]   ;;  %v3728_v18 = vld [vmem:[%s4374_s8 + $0x120] ss:$16 sps:$4 sm:$0xff]   ;;  %v3757_v38 = vld [vmem:[%s4374_s8 + $0x6c] ss:$16 sps:$4 sm:$0xff]  }
  0x1b   : > { %v3729_v19 = vld [vmem:[%s4374_s8 + $0x104] ss:$16 sps:$4 sm:$0xff]   ;;  %v3731_v20 = vld [vmem:[%s4374_s8 + $0x100] ss:$16 sps:$4 sm:$0xff]   ;;  %v3755_v41 = vld [vmem:[%s4374_s8 + $0x68] ss:$16 sps:$4 sm:$0xff]  }
  0x1c   : > { %3606 = vmatpush1.bf16.msra.mxu1 %v3710_v5  ;;  %853 = vmatpush1.bf16.msra.mxu0 %v3710_v5  ;;  %v4412_v25 = vld [vmem:[%s4369_s29 + $0xa4] ss:$8 sps:$4 sm:$0xff]   ;;  %v4418_v28 = vld [vmem:[%s4369_s29] ss:$8 sps:$4 sm:$0xff]   ;;  %v4423_v29 = vld [vmem:[%s4369_s29 + $0x14] ss:$8 sps:$4 sm:$0xff]  }
  0x1d   : > { %3597 = vmatprep.subr.bf16.mxu1 %v3711_v6  ;;  %854 = vmatprep.subr.bf16.mxu0 %v3711_v6  ;;  %v4430_v31 = vld [vmem:[%s4369_s29 + $0xa0] ss:$8 sps:$4 sm:$0xff]   ;;  %v4434_v33 = vld [vmem:[%s4369_s29 + $0xb4] ss:$8 sps:$4 sm:$0xff]   ;;  %v4439_v35 = vld [vmem:[%s4369_s29 + $0x10] ss:$8 sps:$4 sm:$0xff]  }
  0x1e   : > { %v4445_v37 = vld [vmem:[%s4369_s29 + $0x24] ss:$8 sps:$4 sm:$0xff]   ;;  %v4452_v39 = vld [vmem:[%s4369_s29 + $0xb0] ss:$8 sps:$4 sm:$0xff]   ;;  %v4461_v43 = vld [vmem:[%s4369_s29 + $0x20] ss:$8 sps:$4 sm:$0xff]  }
  0x1f   : > { %v4455_v40 = vld [vmem:[%s4369_s29 + $0xc4] ss:$8 sps:$4 sm:$0xff]   ;;  %v3759_v44 = vld [vmem:[%s4374_s8 + $0x48] ss:$16 sps:$4 sm:$0xff]   ;;  %v4467_v45 = vld [vmem:[%s4369_s29 + $0x34] ss:$8 sps:$4 sm:$0xff]  }
  0x20   : > { %3607 = vmatpush1.bf16.msra.mxu1 %v3713_v7  ;;  %855 = vmatpush1.bf16.msra.mxu0 %v3713_v7  ;;  %v3761_v42 = vld [vmem:[%s4374_s8 + $0x4c] ss:$16 sps:$4 sm:$0xff]   ;;  %v4474_v47 = vld [vmem:[%s4369_s29 + $0xc0] ss:$8 sps:$4 sm:$0xff]   ;;  %v3794_v51 = vld [vmem:[%s4369_s29 + $0x30] ss:$8 sps:$4 sm:$0xff]  }
  0x21   : > { %3598 = vmatprep.subr.bf16.mxu1 %v3714_v8  ;;  %856 = vmatprep.subr.bf16.mxu0 %v3714_v8  ;;  %v3767_v46 = vld [vmem:[%s4374_s8 + $0x2c] ss:$16 sps:$4 sm:$0xff]   ;;  %v3765_v49 = vld [vmem:[%s4374_s8 + $0x28] ss:$16 sps:$4 sm:$0xff]   ;;  %s3413_s13 = sshll.u32 %s5408_s21, 6  ;;  %s3414_s30 = sshll.u32 %s5408_s21, 5 }
  0x22   : > { %v4477_v48 = vld [vmem:[%s4369_s29 + $0xd4] ss:$8 sps:$4 sm:$0xff]   ;;  %v3771_v52 = vld [vmem:[%s4374_s8 + $0x8] ss:$16 sps:$4 sm:$0xff]   ;;  %v3795_v53 = vld [vmem:[%s4369_s29 + $0x44] ss:$8 sps:$4 sm:$0xff]   ;;  %s5087_s16 = scalar_lea.vmem %s5391_s5, %s3413_s13  ;;  %s380_s9 = scalar_lea.vmem %s5392_s6, %s3414_s30 }
  0x23   : > { %v3773_v50 = vld [vmem:[%s4374_s8 + $0xc] ss:$16 sps:$4 sm:$0xff]   ;;  %v4490_v55 = vld [vmem:[%s4369_s29 + $0xd0] ss:$8 sps:$4 sm:$0xff]   ;;  %v3797_v59 = vld [vmem:[%s4369_s29 + $0x40] ss:$8 sps:$4 sm:$0xff]  }
  0x24   : > { %3608 = vmatpush1.bf16.msra.mxu1 %v3716_v10  ;;  %857 = vmatpush1.bf16.msra.mxu0 %v3716_v10  ;;  %v3776_v54 = vld [vmem:[%s4374_s8 + $0x12c] ss:$16 sps:$4 sm:$0xff]   ;;  %v3774_v57 = vld [vmem:[%s4374_s8 + $0x128] ss:$16 sps:$4 sm:$0xff]  }
  0x25   : > { %3599 = vmatprep.subr.bf16.mxu1 %v3717_v11  ;;  %858 = vmatprep.subr.bf16.mxu0 %v3717_v11  ;;  %v4493_v56 = vld [vmem:[%s4369_s29 + $0xe4] ss:$8 sps:$4 sm:$0xff]   ;;  %v3780_v60 = vld [vmem:[%s4374_s8 + $0x108] ss:$16 sps:$4 sm:$0xff]   ;;  %v3798_v61 = vld [vmem:[%s4369_s29 + $0x54] ss:$8 sps:$4 sm:$0xff]  }
  0x26   : > { %v3782_v58 = vld [vmem:[%s4374_s8 + $0x10c] ss:$16 sps:$4 sm:$0xff]   ;;  %v4505_v62 = vld [vmem:[%s4369_s29 + $0xe0] ss:$8 sps:$4 sm:$0xff]   ;;  %v3800_v0 = vld [vmem:[%s4369_s29 + $0x50] ss:$8 sps:$4 sm:$0xff]  }
  0x27   : > { %v4508_v63 = vld [vmem:[%s4369_s29 + $0xf4] ss:$8 sps:$4 sm:$0xff]   ;;  %v3801_v1 = vld [vmem:[%s4369_s29 + $0x64] ss:$8 sps:$4 sm:$0xff]   ;;  %v4517_v2 = vld [vmem:[%s4369_s29 + $0xf0] ss:$8 sps:$4 sm:$0xff]  }
  0x28   : > { %3609 = vmatpush1.bf16.msra.mxu1 %v3719_v12  ;;  %859 = vmatpush1.bf16.msra.mxu0 %v3719_v12  ;;  %v3803_v3 = vld [vmem:[%s4369_s29 + $0x60] ss:$8 sps:$4 sm:$0xff]   ;;  %v3804_v4 = vld [vmem:[%s4369_s29 + $0x74] ss:$8 sps:$4 sm:$0xff]   ;;  %v3806_v5 = vld [vmem:[%s4369_s29 + $0x70] ss:$8 sps:$4 sm:$0xff]  }
  0x29   : > { %3600 = vmatprep.subr.bf16.mxu1 %v3720_v13  ;;  %860 = vmatprep.subr.bf16.mxu0 %v3720_v13  ;;  %v3807_v6 = vld [vmem:[%s4369_s29 + $0x84] ss:$8 sps:$4 sm:$0xff]   ;;  %v3809_v7 = vld [vmem:[%s4369_s29 + $0x80] ss:$8 sps:$4 sm:$0xff]   ;;  %v3810_v8 = vld [vmem:[%s4544_s12 + $0x78] sm:$0xff]   ;;  %s4308_s29 = smov 96  }
  0x2a   : > { %v3811_v10 = vld [vmem:[%s4544_s12 + $0x38] sm:$0xff]   ;;  %v3812_v11 = vld [vmem:[%s4544_s12 + $0x70] sm:$0xff]   ;;  %v3814_v13 = vld [vmem:[%s4544_s12 + $0x68] sm:$0xff]  }
  0x2b   : > { %v3813_v12 = vld [vmem:[%s4544_s12 + $0x30] sm:$0xff]  }
  0x2c   : > { %3610 = vmatpush1.bf16.msra.mxu1 %v3722_v14  ;;  %861 = vmatpush1.bf16.msra.mxu0 %v3722_v14  ;;  %v3815_v14 = vld [vmem:[%s4544_s12 + $0x28] sm:$0xff]  }
  0x2d   : > { %3601 = vmatprep.subr.bf16.mxu1 %v3723_v15  ;;  %862 = vmatprep.subr.bf16.mxu0 %v3723_v15  ;;  %v3816_v15 = vld [vmem:[%s4544_s12 + $0x60] sm:$0xff]  }
  0x30   : > { %3611 = vmatpush1.bf16.msra.mxu1 %v3725_v16  ;;  %863 = vmatpush1.bf16.msra.mxu0 %v3725_v16  ;;  %v3817_v16 = vld [vmem:[%s4544_s12 + $0x20] sm:$0xff]  }
  0x31   : > { %3602 = vmatprep.subr.bf16.mxu1 %v3726_v17  ;;  %876 = vmatprep.subr.bf16.mxu0 %v3726_v17  ;;  %v3819_v17 = vld [vmem:[%s4544_s12 + $0x18] sm:$0xff]  }
  0x34   : > { %3612 = vmatpush2.bf16.msra.mxu1 %v3728_v18  ;;  %877 = vmatpush2.bf16.msra.mxu0 %v3728_v18  ;;  %v3820_v18 = vld [vmem:[%s4544_s12 + $0x50] sm:$0xff]  }
  0x35   : > { %3603 = vmatprep.subr.bf16.mxu1 %v3729_v19  ;;  %878 = vmatprep.subr.bf16.mxu0 %v3729_v19  ;;  %v3821_v19 = vld [vmem:[%s4544_s12 + $0x10] sm:$0xff]  }
  0x38   : > { %3613 = vmatpush2.bf16.msra.mxu1 %v3731_v20  ;;  %879 = vmatpush2.bf16.msra.mxu0 %v3731_v20  ;;  %v3822_v20 = vld [vmem:[%s4544_s12 + $0x48] sm:$0xff]  }
  0x39   : > { %1041 = vmatprep.subr.bf16.mxu1 %v3737_v21  ;;  %3446 = vmatprep.subr.bf16.mxu0 %v3810_v8  ;;  %v3823_v21 = vld [vmem:[%s4544_s12 + $0x8] sm:$0xff]  }
  0x3b   : > { %971 = vmatmul.mubr.bf16.vlgmr.msra.gmra.mxu1 %v4406_v23  ;;  %881 = vmatmul.mubr.bf16.vlgmr.msra.gmra.mxu0 %v4418_v28 }
  0x3c   : > { %1042 = vmatpush1.bf16.msra.mxu1 %v3735_v24  ;;  %3257 = vmatprep.mubr.msk.bf16.mxu1 %vm799_vm0, %v4412_v25 }
  0x3d   : > { %1043 = vmatprep.subr.bf16.mxu1 %v3740_v26  ;;  %3248 = vmatprep.mubr.msk.bf16.mxu0 %vm799_vm0, %v4423_v29 }
  0x3e   : > { %3447 = vmatpush3.bf16.msra.mxu0 %v3811_v10 }
  0x3f   : > { %3448 = vmatprep.subr.bf16.mxu0 %v3812_v11 }
  0x40   : > { %1044 = vmatpush1.bf16.msra.mxu1 %v3738_v27 }
  0x41   : > { %1045 = vmatprep.subr.bf16.mxu1 %v3746_v30 }
  0x42   : > { %3449 = vmatpush3.bf16.msra.mxu0 %v3813_v12 }
  0x43   : > { %981 = vmatmul.mubr.bf16.gmra.mxu1 %v4430_v31  ;;  %891 = vmatmul.mubr.bf16.gmra.mxu0 %v4439_v35 }
  0x44   : > { %1046 = vmatpush1.bf16.msra.mxu1 %v3744_v32  ;;  %3258 = vmatprep.mubr.msk.bf16.mxu1 %vm799_vm0, %v4434_v33 }
  0x45   : > { %1047 = vmatprep.subr.bf16.mxu1 %v3752_v34  ;;  %3249 = vmatprep.mubr.msk.bf16.mxu0 %vm799_vm0, %v4445_v37 }
  0x46   : > { %3450 = vmatprep.subr.bf16.mxu0 %v3814_v13 }
  0x47   : > { %3451 = vmatpush3.bf16.msra.mxu0 %v3815_v14 }
  0x48   : > { %1048 = vmatpush1.bf16.msra.mxu1 %v3750_v36  ;;  %3452 = vmatprep.subr.bf16.mxu0 %v3816_v15 }
  0x49   : > { %1049 = vmatprep.subr.bf16.mxu1 %v3757_v38 }
  0x4b   : > { %991 = vmatmul.mubr.bf16.gmra.mxu1 %v4452_v39  ;;  %901 = vmatmul.mubr.bf16.gmra.mxu0 %v4461_v43 }
  0x4c   : > { %3259 = vmatprep.mubr.msk.bf16.mxu1 %vm799_vm0, %v4455_v40  ;;  %1050 = vmatpush1.bf16.msra.mxu1 %v3755_v41 }
  0x4d   : > { %1051 = vmatprep.subr.bf16.mxu1 %v3761_v42  ;;  %3250 = vmatprep.mubr.msk.bf16.mxu0 %vm799_vm0, %v4467_v45 }
  0x4e   : > { %3453 = vmatpush3.bf16.msra.mxu0 %v3817_v16 }
  0x50   : > { %1052 = vmatpush1.bf16.msra.mxu1 %v3759_v44 }
  0x51   : > { %1053 = vmatprep.subr.bf16.mxu1 %v3767_v46 }
  0x53   : > { %1001 = vmatmul.mubr.bf16.gmra.mxu1 %v4474_v47  ;;  %911 = vmatmul.mubr.bf16.gmra.mxu0 %v3794_v51 }
  0x54   : > { %3260 = vmatprep.mubr.msk.bf16.mxu1 %vm799_vm0, %v4477_v48  ;;  %1054 = vmatpush1.bf16.msra.mxu1 %v3765_v49 }
  0x55   : > { %1055 = vmatprep.subr.bf16.mxu1 %v3773_v50  ;;  %3251 = vmatprep.mubr.msk.bf16.mxu0 %vm799_vm0, %v3795_v53 }
  0x58   : > { %1056 = vmatpush1.bf16.msra.mxu1 %v3771_v52 }
  0x59   : > { %1069 = vmatprep.subr.bf16.mxu1 %v3776_v54 }
  0x5b   : > { %1011 = vmatmul.mubr.bf16.gmra.mxu1 %v4490_v55  ;;  %921 = vmatmul.mubr.bf16.gmra.mxu0 %v3797_v59 }
  0x5c   : > { %3261 = vmatprep.mubr.msk.bf16.mxu1 %vm799_vm0, %v4493_v56  ;;  %1070 = vmatpush2.bf16.msra.mxu1 %v3774_v57 }
  0x5d   : > { %1071 = vmatprep.subr.bf16.mxu1 %v3782_v58  ;;  %3252 = vmatprep.mubr.msk.bf16.mxu0 %vm799_vm0, %v3798_v61 }
  0x60   : > { %1072 = vmatpush2.bf16.msra.mxu1 %v3780_v60 }
  0x63   : > { %1021 = vmatmul.mubr.bf16.gmra.mxu1 %v4505_v62  ;;  %931 = vmatmul.mubr.bf16.gmra.mxu0 %v3800_v0 }
  0x64   : > { %3262 = vmatprep.mubr.msk.bf16.mxu1 %vm799_vm0, %v4508_v63  ;;  %3253 = vmatprep.mubr.msk.bf16.mxu0 %vm799_vm0, %v3801_v1 }
  0x6b   : > { %1031 = vmatmul.mubr.bf16.gmra.mxu1 %v4517_v2  ;;  %941 = vmatmul.mubr.bf16.gmra.mxu0 %v3803_v3 }
  0x6c   : > { %3263 = vmatprep.mubr.msk.bf16.mxu1 %vm799_vm0, %v4403_v22  ;;  %3254 = vmatprep.mubr.msk.bf16.mxu0 %vm799_vm0, %v3804_v4  ;;  %v3824_v22 = vld [vmem:[%s4544_s12 + $0x40] sm:$0xff]  }
  0x73   : > { %1074 = vmatmul.mubr.bf16.vlgmr.msra.gmra.mxu1 %v4418_v28  ;;  %951 = vmatmul.mubr.bf16.gmra.mxu0 %v3806_v5 }
  0x74   : > { %3264 = vmatprep.mubr.msk.bf16.mxu1 %vm799_vm0, %v4423_v29  ;;  %3255 = vmatprep.mubr.msk.bf16.mxu0 %vm799_vm0, %v3807_v6 }
  0x7b   : > { %1084 = vmatmul.mubr.bf16.gmra.mxu1 %v4439_v35  ;;  %961 = vmatmul.mubr.bf16.gmra.mxu0 %v3809_v7 }
  0x7c   : > { %3265 = vmatprep.mubr.msk.bf16.mxu1 %vm799_vm0, %v4445_v37 }
  0x83   : > { %1094 = vmatmul.mubr.bf16.gmra.mxu1 %v4461_v43 }
  0x84   : > { %3266 = vmatprep.mubr.msk.bf16.mxu1 %vm799_vm0, %v4467_v45 }
  0x8b   : > { %1104 = vmatmul.mubr.bf16.gmra.mxu1 %v3794_v51 }
  0x8c   : > { %3267 = vmatprep.mubr.msk.bf16.mxu1 %vm799_vm0, %v3795_v53 }
  0x93   : > { %1114 = vmatmul.mubr.bf16.gmra.mxu1 %v3797_v59 }
  0x94   : > { %3268 = vmatprep.mubr.msk.bf16.mxu1 %vm799_vm0, %v3798_v61 }
  0x9b   : > { %1124 = vmatmul.mubr.bf16.gmra.mxu1 %v3800_v0 }
  0x9c   : > { %3269 = vmatprep.mubr.msk.bf16.mxu1 %vm799_vm0, %v3801_v1 }
  0xa3   : > { %1134 = vmatmul.mubr.bf16.gmra.mxu1 %v3803_v3 }
  0xa4   : > { %3270 = vmatprep.mubr.msk.bf16.mxu1 %vm799_vm0, %v3804_v4 }
  0xab   : > { %1144 = vmatmul.mubr.bf16.gmra.mxu1 %v3806_v5 }
  0xac   : > { %3271 = vmatprep.mubr.msk.bf16.mxu1 %vm799_vm0, %v3807_v6 }
  0xb3   : > { %1154 = vmatmul.mubr.bf16.gmra.mxu1 %v3809_v7 }
  0xb4   : > { %3272 = vmatprep.mubr.msk.bf16.mxu1 %vm799_vm0, %v4386_v9  ;;  %v3818_v9 = vld [vmem:[%s4544_s12 + $0x58] sm:$0xff]  }
  0xb5   : > { %3454 = vmatprep.subr.bf16.mxu0 %v3818_v9 }
  0xb6   : > { %3455 = vmatpush3.bf16.msra.mxu0 %v3819_v17 }
  0xb7   : > { %3456 = vmatprep.subr.bf16.mxu0 %v3820_v18 }
  0xba   : > { %3457 = vmatpush3.bf16.msra.mxu0 %v3821_v19 }
  0xbb   : > { %1164 = vmatmul.mubr.bf16.gmra.mxu1 %v4406_v23  ;;  %3458 = vmatprep.subr.bf16.mxu0 %v3822_v20  ;;  %v3825_v23 = vld [vmem:[%s4544_s12] sm:$0xff]  }
  0xbc   : > { %3273 = vmatprep.mubr.msk.bf16.mxu1 %vm799_vm0, %v4412_v25 }
  0xbe   : > { %3459 = vmatpush3.bf16.msra.mxu0 %v3823_v21 }
  0xbf   : > { %3460 = vmatprep.subr.bf16.mxu0 %v3824_v22 }
  0xc2   : > { %3461 = vmatpush3.bf16.msra.mxu0 %v3825_v23 }
  0xc3   : > { %1174 = vmatmul.mubr.bf16.gmra.mxu1 %v4430_v31 }
  0xc4   : > { %3274 = vmatprep.mubr.msk.bf16.mxu1 %vm799_vm0, %v4434_v33 }
  0xcb   : > { %1184 = vmatmul.mubr.bf16.gmra.mxu1 %v4452_v39 }
  0xcc   : > { %3275 = vmatprep.mubr.msk.bf16.mxu1 %vm799_vm0, %v4455_v40 }
  0xd3   : > { %1194 = vmatmul.mubr.bf16.gmra.mxu1 %v4474_v47 }
  0xd4   : > { %3276 = vmatprep.mubr.msk.bf16.mxu1 %vm799_vm0, %v4477_v48 }
  0xdb   : > { %1204 = vmatmul.mubr.bf16.gmra.mxu1 %v4490_v55 }
  0xdc   : > { %3277 = vmatprep.mubr.msk.bf16.mxu1 %vm799_vm0, %v4493_v56 }
  0xe3   : > { %1214 = vmatmul.mubr.bf16.gmra.mxu1 %v4505_v62 }
  0xe4   : > { %3278 = vmatprep.mubr.msk.bf16.mxu1 %vm799_vm0, %v4508_v63 }
  0xeb   : > { %1224 = vmatmul.mubr.bf16.gmra.mxu1 %v4517_v2 }
  0xfb   : > { %v4586_v24 = vpop.f32.mrf.mxu1  ;;  %v4606_v34 = vpop.f32.mrf.mxu0 }
  0xfd   : > { %v4588_v25 = vpop.f32.mrf.mxu1  ;;  %v4612_v37 = vpop.f32.mrf.mxu0 }
  0xff   : > { %v4590_v26 = vpop.f32.mrf.mxu1  ;;  %v4618_v40 = vpop.f32.mrf.mxu0 }
 0x101   : > { %v4592_v27 = vpop.f32.mrf.mxu1  ;;  %v4624_v43 = vpop.f32.mrf.mxu0 }
 0x103   : > { %v4594_v28 = vpop.f32.mrf.mxu1  ;;  %v4630_v46 = vpop.f32.mrf.mxu0 }
 0x105   : > { %v4596_v29 = vpop.f32.mrf.mxu1  ;;  %v4636_v49 = vpop.f32.mrf.mxu0 }
 0x107   : > { %v4598_v30 = vpop.f32.mrf.mxu1  ;;  %v4642_v52 = vpop.f32.mrf.mxu0 }
 0x109   : > { %v4600_v31 = vpop.f32.mrf.mxu1  ;;  %v4648_v55 = vpop.f32.mrf.mxu0 }
 0x10b   : > { %v4602_v32 = vpop.f32.mrf.mxu1  ;;  %v4654_v58 = vpop.f32.mrf.mxu0 }
 0x10d   : > { %v4604_v33 = vpop.f32.mrf.mxu1  ;;  %v4660_v61 = vpop.f32.mrf.mxu0 }
 0x10f   : > { %v4608_v35 = vpop.f32.mrf.mxu1  ;;  %v4662_v1 = vpop.f32.mrf.mxu0 }
 0x111   : > { %v4610_v36 = vpop.f32.mrf.mxu1  ;;  %v4664_v6 = vpop.f32.mrf.mxu0 }
 0x113   : > { %v4614_v38 = vpop.f32.mrf.mxu1  ;;  %v4666_v12 = vpop.f32.mrf.mxu0 }
 0x115   : > { %v4616_v39 = vpop.f32.mrf.mxu1  ;;  %v4668_v9 = vpop.f32.mrf.mxu0 }
 0x117   : > { %v4620_v41 = vpop.f32.mrf.mxu1 }
 0x119   : > { %v4622_v42 = vpop.f32.mrf.mxu1 }
 0x11b   : > { %v4626_v44 = vpop.f32.mrf.mxu1 }
 0x11d   : > { %v4628_v45 = vpop.f32.mrf.mxu1 }
 0x11f   : > { %v4632_v47 = vpop.f32.mrf.mxu1 }
 0x121   : > { %v4634_v48 = vpop.f32.mrf.mxu1 }
 0x123   : > { %v4638_v50 = vpop.f32.mrf.mxu1 }
 0x124   : > { %5393 = vst [vmem:[#allocation2_spill] sm:$0xff] %v4638_v50 }
 0x125   : > { %v4640_v51 = vpop.f32.mrf.mxu1 }
 0x127   : > { %v4644_v53 = vpop.f32.mrf.mxu1 }
 0x129   : > { %v4646_v54 = vpop.f32.mrf.mxu1 }
 0x12b   : > { %v4650_v56 = vpop.f32.mrf.mxu1 }
 0x12c   : > { %5394 = vst [vmem:[#allocation3_spill] sm:$0xff] %v4650_v56 }
 0x12d   : > { %v4652_v57 = vpop.f32.mrf.mxu1 }
 0x12e   : > { %5395 = vst [vmem:[#allocation4_spill] sm:$0xff] %v4652_v57 }
 0x12f   : > { %v4656_v59 = vpop.f32.mrf.mxu1 }
 0x130   : > { %5396 = vst [vmem:[#allocation5_spill] sm:$0xff] %v4656_v59 }
 0x131   : > { %v4658_v60 = vpop.f32.mrf.mxu1 }
 0x132   : > { %5397 = vst [vmem:[#allocation6_spill] sm:$0xff] %v4658_v60 }
 0x133   : > { %v1075_v62 = vpop.f32.mrf.mxu1 }
 0x134   : > { %v3279_v63 = vmul.f32 -1.442695, %v1075_v62  ;;  %v4670_v62 = vpop.f32.mrf.mxu0 }
 0x135   : > { %v1077_v0 = vpop.f32.mrf.mxu1 }
 0x136   : > { %3834 = vpow2.f32 %v3279_v63  ;;  %v3280_v2 = vmul.f32 -1.442695, %v1077_v0 }
 0x137   : > { %v1079_v3 = vpop.f32.mrf.mxu1 }
 0x138   : > { %3836 = vpow2.f32 %v3280_v2  ;;  %v3281_v4 = vmul.f32 -1.442695, %v1079_v3 }
 0x139   : > { %v1081_v5 = vpop.f32.mrf.mxu1 }
 0x13a   : > { %3838 = vpow2.f32 %v3281_v4  ;;  %v3282_v7 = vmul.f32 -1.442695, %v1081_v5 }
 0x13b   : > { %v1085_v8 = vpop.f32.mrf.mxu1 }
 0x13c   : > { %3840 = vpow2.f32 %v3282_v7  ;;  %v3283_v10 = vmul.f32 -1.442695, %v1085_v8 }
 0x13d   : > { %v1087_v11 = vpop.f32.mrf.mxu1 }
 0x13e   : > { %3842 = vpow2.f32 %v3283_v10  ;;  %v3284_v13 = vmul.f32 -1.442695, %v1087_v11  ;;  %v4672_v10 = vpop.f32.mrf.mxu0 }
 0x13f   : > { %v1089_v14 = vpop.f32.mrf.mxu1 }
 0x140   : > { %3844 = vpow2.f32 %v3284_v13  ;;  %v3285_v15 = vmul.f32 -1.442695, %v1089_v14 }
 0x141   : > { %v1091_v16 = vpop.f32.mrf.mxu1 }
 0x142   : > { %3846 = vpow2.f32 %v3285_v15  ;;  %v3286_v17 = vmul.f32 -1.442695, %v1091_v16 }
 0x143   : > { %v3835_v18 = vpop.eup %3834  ;;  %v1095_v19 = vpop.f32.mrf.mxu1 }
 0x144   : > { %v1426_v20 = vadd.f32 1.0, %v3835_v18  ;;  %3848 = vpow2.f32 %v3286_v17  ;;  %v3287_v21 = vmul.f32 -1.442695, %v1095_v19 }
 0x145   : > { %v3837_v22 = vpop.eup %3836  ;;  %v1097_v23 = vpop.f32.mrf.mxu1 }
 0x146   : > { %3850 = vrcp.f32 %v1426_v20  ;;  %v1427_v63 = vadd.f32 1.0, %v3837_v22  ;;  %v3288_v0 = vmul.f32 -1.442695, %v1097_v23  ;;  %v4674_v20 = vpop.f32.mrf.mxu0 }
 0x147   : > { %v3839_v2 = vpop.eup %3838  ;;  %3852 = vpow2.f32 %v3287_v21  ;;  %v1099_v3 = vpop.f32.mrf.mxu1 }
 0x148   : > { %3854 = vrcp.f32 %v1427_v63  ;;  %v1428_v4 = vadd.f32 1.0, %v3839_v2  ;;  %v3289_v5 = vmul.f32 -1.442695, %v1099_v3 }
 0x149   : > { %v3841_v7 = vpop.eup %3840  ;;  %3856 = vpow2.f32 %v3288_v0  ;;  %v1101_v8 = vpop.f32.mrf.mxu1 }
 0x14a   : > { %3858 = vrcp.f32 %v1428_v4  ;;  %v1429_v11 = vadd.f32 1.0, %v3841_v7  ;;  %v3290_v13 = vmul.f32 -1.442695, %v1101_v8 }
 0x14b   : > { %v3843_v14 = vpop.eup %3842  ;;  %3860 = vpow2.f32 %v3289_v5  ;;  %v1105_v15 = vpop.f32.mrf.mxu1 }
 0x14c   : > { %3862 = vrcp.f32 %v1429_v11  ;;  %v1430_v16 = vadd.f32 1.0, %v3843_v14  ;;  %v3291_v17 = vmul.f32 -1.442695, %v1105_v15  ;;  %v4676_v5 = vpop.f32.mrf.mxu0 }
 0x14d   : > { %v3845_v18 = vpop.eup %3844  ;;  %3864 = vpow2.f32 %v3290_v13  ;;  %v1107_v19 = vpop.f32.mrf.mxu1 }
 0x14e   : > { %3866 = vrcp.f32 %v1430_v16  ;;  %v1431_v21 = vadd.f32 1.0, %v3845_v18  ;;  %v3292_v22 = vmul.f32 -1.442695, %v1107_v19  ;;  %v4678_v19 = vpop.f32.mrf.mxu0 }
 0x14f   : > { %v3847_v23 = vpop.eup %3846  ;;  %3868 = vpow2.f32 %v3291_v17  ;;  %v1109_v63 = vpop.f32.mrf.mxu1 }
 0x150   : > { %3870 = vrcp.f32 %v1431_v21  ;;  %v1432_v0 = vadd.f32 1.0, %v3847_v23  ;;  %v3293_v2 = vmul.f32 -1.442695, %v1109_v63 }
 0x151   : > { %v3849_v3 = vpop.eup %3848  ;;  %3872 = vpow2.f32 %v3292_v22  ;;  %v1111_v4 = vpop.f32.mrf.mxu1 }
 0x152   : > { %3874 = vrcp.f32 %v1432_v0  ;;  %v1433_v7 = vadd.f32 1.0, %v3849_v3  ;;  %v3294_v8 = vmul.f32 -1.442695, %v1111_v4 }
 0x153   : > { %v3851_v11 = vpop.eup %3850  ;;  %3876 = vpow2.f32 %v3293_v2  ;;  %v1115_v13 = vpop.f32.mrf.mxu1 }
 0x154   : > { %v3853_v14 = vpop.eup %3852  ;;  %3878 = vrcp.f32 %v1433_v7  ;;  %v3295_v15 = vmul.f32 -1.442695, %v1115_v13 }
 0x155   : > { %v3855_v16 = vpop.eup %3854  ;;  %v1434_v17 = vadd.f32 1.0, %v3853_v14  ;;  %3880 = vpow2.f32 %v3294_v8  ;;  %v1117_v18 = vpop.f32.mrf.mxu1 }
 0x156   : > { %v3857_v21 = vpop.eup %3856  ;;  %3882 = vpow2.f32 %v3295_v15  ;;  %v3296_v22 = vmul.f32 -1.442695, %v1117_v18  ;;  %v4681_v8 = vpop.f32.mrf.mxu0  ;;  %v1619_v60 = vmul.f32 %v3855_v16, %v4612_v37 }
 0x157   : > { %v3859_v23 = vpop.eup %3858  ;;  %3884 = vrcp.f32 %v1434_v17  ;;  %v1435_v63 = vadd.f32 1.0, %v3857_v21  ;;  %v1119_v0 = vpop.f32.mrf.mxu1 }
 0x158   : > { %v3861_v3 = vpop.eup %3860  ;;  %3886 = vpow2.f32 %v3296_v22  ;;  %v3297_v2 = vmul.f32 -1.442695, %v1119_v0  ;;  %v1620_v13 = vmul.f32 %v3859_v23, %v4618_v40  ;;  %v1618_v22 = vmul.f32 %v3851_v11, %v4606_v34  ;;  %v4686_v37 = vpop.f32.mrf.mxu0 }
 0x159   : > { %v3863_v4 = vpop.eup %3862  ;;  %3888 = vrcp.f32 %v1435_v63  ;;  %v1436_v7 = vadd.f32 1.0, %v3861_v3  ;;  %v1121_v14 = vpop.f32.mrf.mxu1 }
 0x15a   : > { %v3865_v56 = vpop.eup %3864  ;;  %v1621_v15 = vmul.f32 %v3863_v4, %v4624_v43  ;;  %3890 = vpow2.f32 %v3297_v2  ;;  %v3298_v17 = vmul.f32 -1.442695, %v1121_v14  ;;  %v1682_v59 = vpack.c.bf16 %v1620_v13, %v1618_v22 }
 0x15b   : > { %v3867_v18 = vpop.eup %3866  ;;  %3892 = vrcp.f32 %v1436_v7  ;;  %v1437_v21 = vadd.f32 1.0, %v3865_v56  ;;  %v1125_v0 = vpop.f32.mrf.mxu1 }
 0x15c   : > { %v3869_v63 = vpop.eup %3868  ;;  %v1683_v3 = vpack.c.bf16 %v1621_v15, %v1619_v60  ;;  %3894 = vpow2.f32 %v3298_v17  ;;  %v3299_v40 = vmul.f32 -1.442695, %v1125_v0  ;;  %v4689_v15 = vpop.f32.mrf.mxu0  ;;  %v1622_v0 = vmul.f32 %v3867_v18, %v4630_v46 }
 0x15d   : > { %v3871_v23 = vpop.eup %3870  ;;  %3896 = vrcp.f32 %v1437_v21  ;;  %v1438_v57 = vadd.f32 1.0, %v3869_v63  ;;  %v1127_v50 = vpop.f32.mrf.mxu1 }
 0x15e   : > { %v3873_v43 = vpop.eup %3872  ;;  %3898 = vpow2.f32 %v3299_v40  ;;  %v3300_v16 = vmul.f32 -1.442695, %v1127_v50  ;;  %1874 = vmatprep.mubr.bf16.mxu0 %v1683_v3  ;;  %v1623_v50 = vmul.f32 %v3871_v23, %v4636_v49  ;;  %v4694_v49 = vpop.f32.mrf.mxu0 }
 0x15f   : > { %v3875_v2 = vpop.eup %3874  ;;  %3900 = vrcp.f32 %v1438_v57  ;;  %v1439_v56 = vadd.f32 1.0, %v3873_v43  ;;  %v1129_v34 = vpop.f32.mrf.mxu1  ;;  %1875 = vmatmul.mubr.bf16.vlgmr.msra.gmra.mxu0 %v1682_v59 }
 0x160   : > { %v3877_v11 = vpop.eup %3876  ;;  %3902 = vpow2.f32 %v3300_v16  ;;  %v3301_v60 = vmul.f32 -1.442695, %v1129_v34  ;;  %v1624_v13 = vmul.f32 %v3875_v2, %v4642_v52 }
 0x161   : > { %v3879_v4 = vpop.eup %3878  ;;  %3904 = vrcp.f32 %v1439_v56  ;;  %v1440_v7 = vadd.f32 1.0, %v3877_v11  ;;  %v1131_v14 = vpop.f32.mrf.mxu1 }
 0x162   : > { %v3881_v17 = vpop.eup %3880  ;;  %v1625_v21 = vmul.f32 %v3879_v4, %v4648_v55  ;;  %3906 = vpow2.f32 %v3301_v60  ;;  %v3302_v57 = vmul.f32 -1.442695, %v1131_v14  ;;  %v1684_v2 = vpack.c.bf16 %v1624_v13, %v1622_v0  ;;  %v4696_v13 = vpop.f32.mrf.mxu0 }
 0x163   : > { %v3883_v22 = vpop.eup %3882  ;;  %3908 = vrcp.f32 %v1440_v7  ;;  %v1441_v59 = vadd.f32 1.0, %v3881_v17  ;;  %v1135_v63 = vpop.f32.mrf.mxu1 }
 0x164   : > { %v3885_v3 = vpop.eup %3884  ;;  %v1442_v40 = vadd.f32 1.0, %v3883_v22  ;;  %v1685_v43 = vpack.c.bf16 %v1625_v21, %v1623_v50  ;;  %3910 = vpow2.f32 %v3302_v57  ;;  %v3303_v52 = vmul.f32 -1.442695, %v1135_v63 }
 0x165   : > { %v3887_v16 = vpop.eup %3886  ;;  %3912 = vrcp.f32 %v1441_v59  ;;  %v1137_v56 = vpop.f32.mrf.mxu1 }
 0x166   : > { %v3889_v55 = vpop.eup %3888  ;;  %3914 = vrcp.f32 %v1442_v40  ;;  %v1443_v23 = vadd.f32 1.0, %v3887_v16  ;;  %v3304_v34 = vmul.f32 -1.442695, %v1137_v56  ;;  %1882 = vmatprep.mubr.bf16.mxu0 %v1685_v43 }
 0x167   : > { %v3891_v11 = vpop.eup %3890  ;;  %3916 = vpow2.f32 %v3303_v52  ;;  %v1139_v46 = vpop.f32.mrf.mxu1  ;;  %1883 = vmatmul.mubr.bf16.gmra.mxu0 %v1684_v2  ;;  %v1627_v59 = vmul.f32 %v3889_v55, %v4660_v61  ;;  %v1626_v52 = vmul.f32 %v3885_v3, %v4654_v58 }
 0x168   : > { %v3893_v18 = vpop.eup %3892  ;;  %3918 = vrcp.f32 %v1443_v23  ;;  %v1444_v60 = vadd.f32 1.0, %v3891_v11  ;;  %v3305_v4 = vmul.f32 -1.442695, %v1139_v46 }
 0x169   : > { %v3895_v7 = vpop.eup %3894  ;;  %3920 = vpow2.f32 %v3304_v34  ;;  %v1141_v14 = vpop.f32.mrf.mxu1  ;;  %v1628_v21 = vmul.f32 %v3893_v18, %v4662_v1 }
 0x16a   : > { %v3897_v17 = vpop.eup %3896  ;;  %3922 = vrcp.f32 %v1444_v60  ;;  %v1445_v50 = vadd.f32 1.0, %v3895_v7  ;;  %v3306_v57 = vmul.f32 -1.442695, %v1141_v14  ;;  %v4702_v34 = vpop.f32.mrf.mxu0 }
 0x16b   : > { %v3899_v22 = vpop.eup %3898  ;;  %v1629_v0 = vmul.f32 %v3897_v17, %v4664_v6  ;;  %3924 = vpow2.f32 %v3305_v4  ;;  %v1145_v63 = vpop.f32.mrf.mxu1  ;;  %v1686_v61 = vpack.c.bf16 %v1628_v21, %v1626_v52 }
 0x16c   : > { %v3901_v40 = vpop.eup %3900  ;;  %3926 = vrcp.f32 %v1445_v50  ;;  %v1446_v43 = vadd.f32 1.0, %v3899_v22  ;;  %v3307_v16 = vmul.f32 -1.442695, %v1145_v63  ;;  %v4704_v7 = vpop.f32.mrf.mxu0 }
 0x16d   : > { %v3903_v2 = vpop.eup %3902  ;;  %v1687_v56 = vpack.c.bf16 %v1629_v0, %v1627_v59  ;;  %3928 = vpow2.f32 %v3306_v57  ;;  %v1147_v23 = vpop.f32.mrf.mxu1 }
 0x16e   : > { %v3905_v1 = vpop.eup %3904  ;;  %3930 = vrcp.f32 %v1446_v43  ;;  %v1447_v11 = vadd.f32 1.0, %v3903_v2  ;;  %v3308_v55 = vmul.f32 -1.442695, %v1147_v23  ;;  %v1630_v43 = vmul.f32 %v3901_v40, %v4666_v12 }
 0x16f   : > { %v3907_v6 = vpop.eup %3906  ;;  %3932 = vpow2.f32 %v3307_v16  ;;  %1890 = vmatprep.mubr.bf16.mxu0 %v1687_v56  ;;  %v1149_v46 = vpop.f32.mrf.mxu1  ;;  %v1631_v22 = vmul.f32 %v3905_v1, %v4668_v9 }
 0x170   : > { %v3909_v18 = vpop.eup %3908  ;;  %3934 = vrcp.f32 %v1447_v11  ;;  %v1448_v60 = vadd.f32 1.0, %v3907_v6  ;;  %v3309_v58 = vmul.f32 -1.442695, %v1149_v46  ;;  %1891 = vmatmul.mubr.bf16.gmra.mxu0 %v1686_v61  ;;  %v4710_v11 = vpop.f32.mrf.mxu0 }
 0x171   : > { %v3911_v3 = vpop.eup %3910  ;;  %3936 = vpow2.f32 %v3308_v55  ;;  %v1151_v4 = vpop.f32.mrf.mxu1  ;;  %v1632_v50 = vmul.f32 %v3909_v18, %v4670_v62 }
 0x172   : > { %v3913_v14 = vpop.eup %3912  ;;  %3938 = vrcp.f32 %v1448_v60  ;;  %v1449_v17 = vadd.f32 1.0, %v3911_v3  ;;  %v3310_v21 = vmul.f32 -1.442695, %v1151_v4 }
 0x173   : > { %v3915_v57 = vpop.eup %3914  ;;  %v1633_v59 = vmul.f32 %v3913_v14, %v4672_v10  ;;  %3940 = vpow2.f32 %v3309_v58  ;;  %v1155_v0 = vpop.f32.mrf.mxu1  ;;  %v1688_v61 = vpack.c.bf16 %v1632_v50, %v1630_v43 }
 0x174   : > { %v3917_v63 = vpop.eup %3916  ;;  %3942 = vrcp.f32 %v1449_v17  ;;  %v3311_v52 = vmul.f32 -1.442695, %v1155_v0  ;;  %v4713_v58 = vpop.f32.mrf.mxu0  ;;  %v1634_v0 = vmul.f32 %v3915_v57, %v4674_v20 }
 0x175   : > { %v3919_v16 = vpop.eup %3918  ;;  %v1450_v2 = vadd.f32 1.0, %v3917_v63  ;;  %v1689_v56 = vpack.c.bf16 %v1633_v59, %v1631_v22  ;;  %3944 = vpow2.f32 %v3310_v21  ;;  %v1157_v23 = vpop.f32.mrf.mxu1 }
 0x176   : > { %v3921_v62 = vpop.eup %3920  ;;  %3946 = vpow2.f32 %v3311_v52  ;;  %v3312_v9 = vmul.f32 -1.442695, %v1157_v23  ;;  %v1635_v18 = vmul.f32 %v3919_v16, %v4676_v5 }
 0x177   : > { %v3923_v1 = vpop.eup %3922  ;;  %3948 = vrcp.f32 %v1450_v2  ;;  %v1451_v10 = vadd.f32 1.0, %v3921_v62  ;;  %1898 = vmatprep.mubr.bf16.mxu0 %v1689_v56  ;;  %v1159_v55 = vpop.f32.mrf.mxu1 }
 0x178   : > { %v3925_v6 = vpop.eup %3924  ;;  %3950 = vpow2.f32 %v3312_v9  ;;  %v3313_v12 = vmul.f32 -1.442695, %v1159_v55  ;;  %1899 = vmatmul.mubr.bf16.gmra.mxu0 %v1688_v61  ;;  %v1636_v4 = vmul.f32 %v3923_v1, %v4678_v19  ;;  %v4718_v2 = vpop.f32.mrf.mxu0 }
 0x179   : > { %v3927_v40 = vpop.eup %3926  ;;  %3952 = vrcp.f32 %v1451_v10  ;;  %v1452_v46 = vadd.f32 1.0, %v3925_v6  ;;  %v1161_v60 = vpop.f32.mrf.mxu1 }
 0x17a   : > { %v3929_v3 = vpop.eup %3928  ;;  %v1637_v14 = vmul.f32 %v3927_v40, %v4681_v8  ;;  %3954 = vpow2.f32 %v3313_v12  ;;  %v3314_v17 = vmul.f32 -1.442695, %v1161_v60  ;;  %v1690_v8 = vpack.c.bf16 %v1636_v4, %v1634_v0  ;;  %v4721_v6 = vpop.f32.mrf.mxu0 }
 0x17b   : > { %v3931_v50 = vpop.eup %3930  ;;  %3956 = vrcp.f32 %v1452_v46  ;;  %v1453_v21 = vadd.f32 1.0, %v3929_v3  ;;  %v1165_v22 = vpop.f32.mrf.mxu1 }
 0x17c   : > { %v3933_v59 = vpop.eup %3932  ;;  %v1691_v63 = vpack.c.bf16 %v1637_v14, %v1635_v18  ;;  %3958 = vpow2.f32 %v3314_v17  ;;  %v3315_v5 = vmul.f32 -1.442695, %v1165_v22  ;;  %v1638_v4 = vmul.f32 %v3931_v50, %v4686_v37 }
 0x17d   : > { %v3935_v43 = vpop.eup %3934  ;;  %3960 = vrcp.f32 %v1453_v21  ;;  %v1454_v52 = vadd.f32 1.0, %v3933_v59  ;;  %v1167_v16 = vpop.f32.mrf.mxu1 }
 0x17e   : > { %v3937_v19 = vpop.eup %3936  ;;  %3962 = vpow2.f32 %v3315_v5  ;;  %v3316_v56 = vmul.f32 -1.442695, %v1167_v16  ;;  %1906 = vmatprep.mubr.bf16.mxu0 %v1691_v63  ;;  %v1639_v10 = vmul.f32 %v3935_v43, %v4689_v15  ;;  %v956_v63 = vpop.f32.mrf.mxu0 }
 0x17f   : > { %v3939_v23 = vpop.eup %3938  ;;  %3964 = vrcp.f32 %v1454_v52  ;;  %v1455_v62 = vadd.f32 1.0, %v3937_v19  ;;  %v1169_v61 = vpop.f32.mrf.mxu1 }
 0x180   : > { %v3941_v9 = vpop.eup %3940  ;;  %3966 = vpow2.f32 %v3316_v56  ;;  %v3317_v20 = vmul.f32 -1.442695, %v1169_v61  ;;  %1907 = vmatmul.mubr.bf16.gmra.mxu0 %v1690_v8  ;;  %v1640_v40 = vmul.f32 %v3939_v23, %v4694_v49  ;;  %v958_v23 = vpop.f32.mrf.mxu0 }
 0x181   : > { %v3943_v57 = vpop.eup %3942  ;;  %3968 = vrcp.f32 %v1455_v62  ;;  %v1456_v1 = vadd.f32 1.0, %v3941_v9  ;;  %v1171_v55 = vpop.f32.mrf.mxu1 }
 0x182   : > { %v3945_v12 = vpop.eup %3944  ;;  %v1641_v46 = vmul.f32 %v3943_v57, %v4696_v13  ;;  %3970 = vpow2.f32 %v3317_v20  ;;  %v3318_v18 = vmul.f32 -1.442695, %v1171_v55  ;;  %v1692_v5 = vpack.c.bf16 %v1640_v40, %v1638_v4 }
 0x183   : > { %v3947_v60 = vpop.eup %3946  ;;  %3972 = vrcp.f32 %v1456_v1  ;;  %v1457_v3 = vadd.f32 1.0, %v3945_v12  ;;  %v1175_v14 = vpop.f32.mrf.mxu1 }
 0x184   : > { %v3949_v17 = vpop.eup %3948  ;;  %v1458_v21 = vadd.f32 1.0, %v3947_v60  ;;  %v1693_v22 = vpack.c.bf16 %v1641_v46, %v1639_v10  ;;  %3974 = vpow2.f32 %v3318_v18  ;;  %v3319_v15 = vmul.f32 -1.442695, %v1175_v14  ;;  %v4730_v14 = vpop.f32.mrf.mxu0 }
 0x185   : > { %v3951_v59 = vpop.eup %3950  ;;  %3976 = vrcp.f32 %v1457_v3  ;;  %v1177_v0 = vpop.f32.mrf.mxu1  ;;  %v1642_v46 = vmul.f32 %v3949_v17, %v4702_v34 }
 0x186   : > { %v3953_v49 = vpop.eup %3952  ;;  %3978 = vrcp.f32 %v1458_v21  ;;  %v1459_v13 = vadd.f32 1.0, %v3951_v59  ;;  %v3320_v43 = vmul.f32 -1.442695, %v1177_v0  ;;  %1914 = vmatprep.mubr.bf16.mxu0 %v1693_v22 }
 0x187   : > { %v3955_v52 = vpop.eup %3954  ;;  %3980 = vpow2.f32 %v3319_v15  ;;  %v1179_v16 = vpop.f32.mrf.mxu1  ;;  %v1643_v1 = vmul.f32 %v3953_v49, %v4704_v7 }
 0x188   : > { %v3957_v37 = vpop.eup %3956  ;;  %3982 = vrcp.f32 %v1459_v13  ;;  %v1460_v50 = vadd.f32 1.0, %v3955_v52  ;;  %v3321_v19 = vmul.f32 -1.442695, %v1179_v16  ;;  %1915 = vmatmul.mubr.bf16.gmra.mxu0 %v1692_v5  ;;  %v964_v49 = vpop.f32.mrf.mxu0 }
 0x189   : > { %v3959_v8 = vpop.eup %3958  ;;  %3984 = vpow2.f32 %v3320_v43  ;;  %v1181_v56 = vpop.f32.mrf.mxu1  ;;  %v1644_v9 = vmul.f32 %v3957_v37, %v4710_v11 }
 0x18a   : > { %v3961_v62 = vpop.eup %3960  ;;  %3986 = vrcp.f32 %v1460_v50  ;;  %v1461_v61 = vadd.f32 1.0, %v3959_v8  ;;  %v3322_v20 = vmul.f32 -1.442695, %v1181_v56 }
 0x18b   : > { %v3963_v57 = vpop.eup %3962  ;;  %v1645_v10 = vmul.f32 %v3961_v62, %v4713_v58  ;;  %3988 = vpow2.f32 %v3321_v19  ;;  %v1185_v55 = vpop.f32.mrf.mxu1  ;;  %v1694_v7 = vpack.c.bf16 %v1644_v9, %v1642_v46 }
 0x18c   : > { %v3965_v12 = vpop.eup %3964  ;;  %3990 = vrcp.f32 %v1461_v61  ;;  %v1462_v40 = vadd.f32 1.0, %v3963_v57  ;;  %v3323_v18 = vmul.f32 -1.442695, %v1185_v55 }
 0x18d   : > { %v3967_v60 = vpop.eup %3966  ;;  %v1695_v3 = vpack.c.bf16 %v1645_v10, %v1643_v1  ;;  %3992 = vpow2.f32 %v3322_v20  ;;  %v1187_v4 = vpop.f32.mrf.mxu1  ;;  %v1646_v62 = vmul.f32 %v3965_v12, %v4718_v2 }
 0x18e   : > { %v3969_v11 = vpop.eup %3968  ;;  %3994 = vrcp.f32 %v1462_v40  ;;  %v1463_v21 = vadd.f32 1.0, %v3967_v60  ;;  %v3324_v22 = vmul.f32 -1.442695, %v1187_v4  ;;  %v966_v1 = vpop.f32.mrf.mxu0 }
 0x18f   : > { %v3971_v58 = vpop.eup %3970  ;;  %3996 = vpow2.f32 %v3323_v18  ;;  %1922 = vmatprep.mubr.bf16.mxu0 %v1695_v3  ;;  %v1189_v15 = vpop.f32.mrf.mxu1  ;;  %v1647_v50 = vmul.f32 %v3969_v11, %v4721_v6 }
 0x190   : > { %v3973_v59 = vpop.eup %3972  ;;  %3998 = vrcp.f32 %v1463_v21  ;;  %v1464_v0 = vadd.f32 1.0, %v3971_v58  ;;  %v3325_v34 = vmul.f32 -1.442695, %v1189_v15  ;;  %1923 = vmatmul.mubr.bf16.gmra.mxu0 %v1694_v7  ;;  %v968_v4 = vpop.f32.mrf.mxu0 }
 0x191   : > { %v3975_v17 = vpop.eup %3974  ;;  %4000 = vpow2.f32 %v3324_v22  ;;  %v1191_v13 = vpop.f32.mrf.mxu1  ;;  %v1648_v52 = vmul.f32 %v3973_v59, %v956_v63 }
 0x192   : > { %v3977_v5 = vpop.eup %3976  ;;  %4002 = vrcp.f32 %v1464_v0  ;;  %v1465_v43 = vadd.f32 1.0, %v3975_v17  ;;  %v3326_v16 = vmul.f32 -1.442695, %v1191_v13 }
 0x193   : > { %v3979_v37 = vpop.eup %3978  ;;  %v1649_v19 = vmul.f32 %v3977_v5, %v958_v23  ;;  %4004 = vpow2.f32 %v3325_v34  ;;  %v1195_v8 = vpop.f32.mrf.mxu1  ;;  %v1696_v63 = vpack.c.bf16 %v1648_v52, %v1646_v62 }
 0x194   : > { %v3981_v56 = vpop.eup %3980  ;;  %4006 = vrcp.f32 %v1465_v43  ;;  %v3327_v61 = vmul.f32 -1.442695, %v1195_v8  ;;  %v1650_v17 = vmul.f32 %v3979_v37, %v4730_v14 }
 0x195   : > { %v3983_v9 = vpop.eup %3982  ;;  %v1466_v20 = vadd.f32 1.0, %v3981_v56  ;;  %v1697_v57 = vpack.c.bf16 %v1649_v19, %v1647_v50  ;;  %4008 = vpow2.f32 %v3326_v16  ;;  %v1197_v10 = vpop.f32.mrf.mxu1 }
 0x196   : > { %v3985_v55 = vpop.eup %3984  ;;  %4010 = vpow2.f32 %v3327_v61  ;;  %v3328_v40 = vmul.f32 -1.442695, %v1197_v10  ;;  %v1651_v3 = vmul.f32 %v3983_v9, %v964_v49 }
 0x197   : > { %v3987_v46 = vpop.eup %3986  ;;  %4012 = vrcp.f32 %v1466_v20  ;;  %v1467_v6 = vadd.f32 1.0, %v3985_v55  ;;  %1930 = vmatprep.mubr.bf16.mxu0 %v1697_v57  ;;  %v1199_v23 = vpop.f32.mrf.mxu1 }
 0x198   : > { %v3989_v18 = vpop.eup %3988  ;;  %4014 = vpow2.f32 %v3328_v40  ;;  %v3329_v60 = vmul.f32 -1.442695, %v1199_v23  ;;  %1931 = vmatmul.mubr.bf16.gmra.mxu0 %v1696_v63  ;;  %v1652_v7 = vmul.f32 %v3987_v46, %v966_v1 }
 0x199   : > { %v3991_v2 = vpop.eup %3990  ;;  %4016 = vrcp.f32 %v1467_v6  ;;  %v1468_v12 = vadd.f32 1.0, %v3989_v18  ;;  %v1201_v11 = vpop.f32.mrf.mxu1 }
 0x19a   : > { %v3993_v21 = vpop.eup %3992  ;;  %v1653_v22 = vmul.f32 %v3991_v2, %v968_v4  ;;  %4018 = vpow2.f32 %v3329_v60  ;;  %v3330_v58 = vmul.f32 -1.442695, %v1201_v11  ;;  %v1698_v50 = vpack.c.bf16 %v1652_v7, %v1650_v17 }
 0x19b   : > { %v3995_v15 = vpop.eup %3994  ;;  %4020 = vrcp.f32 %v1468_v12  ;;  %v1469_v59 = vadd.f32 1.0, %v3993_v21  ;;  %v1205_v0 = vpop.f32.mrf.mxu1 }
 0x19c   : > { %v3997_v34 = vpop.eup %3996  ;;  %v1699_v13 = vpack.c.bf16 %v1653_v22, %v1651_v3  ;;  %4022 = vpow2.f32 %v3330_v58  ;;  %v3331_v5 = vmul.f32 -1.442695, %v1205_v0  ;;  %v1654_v23 = vmul.f32 %v3995_v15, %v4586_v24 }
 0x19d   : > { %v3999_v43 = vpop.eup %3998  ;;  %4024 = vrcp.f32 %v1469_v59  ;;  %v1470_v49 = vadd.f32 1.0, %v3997_v34  ;;  %v1207_v52 = vpop.f32.mrf.mxu1 }
 0x19e   : > { %v4001_v16 = vpop.eup %4000  ;;  %4026 = vpow2.f32 %v3331_v5  ;;  %v3332_v19 = vmul.f32 -1.442695, %v1207_v52  ;;  %1938 = vmatprep.mubr.bf16.mxu0 %v1699_v13  ;;  %v1655_v57 = vmul.f32 %v3999_v43, %v4588_v25 }
 0x19f   : > { %v4003_v8 = vpop.eup %4002  ;;  %4028 = vrcp.f32 %v1470_v49  ;;  %v1471_v56 = vadd.f32 1.0, %v4001_v16  ;;  %v1209_v62 = vpop.f32.mrf.mxu1 }
 0x1a0   : > { %v4005_v61 = vpop.eup %4004  ;;  %4030 = vpow2.f32 %v3332_v19  ;;  %v3333_v9 = vmul.f32 -1.442695, %v1209_v62  ;;  %1939 = vmatmul.mubr.bf16.gmra.mxu0 %v1698_v50  ;;  %v1656_v63 = vmul.f32 %v4003_v8, %v4590_v26 }
 0x1a1   : > { %v4007_v14 = vpop.eup %4006  ;;  %4032 = vrcp.f32 %v1471_v56  ;;  %v1472_v37 = vadd.f32 1.0, %v4005_v61  ;;  %v1211_v20 = vpop.f32.mrf.mxu1 }
 0x1a2   : > { %v4009_v1 = vpop.eup %4008  ;;  %4034 = vpow2.f32 %v3333_v9  ;;  %v3334_v10 = vmul.f32 -1.442695, %v1211_v20  ;;  %v1657_v55 = vmul.f32 %v4007_v14, %v4592_v27  ;;  %v1700_v26 = vpack.c.bf16 %v1656_v63, %v1654_v23 }
 0x1a3   : > { %v4011_v40 = vpop.eup %4010  ;;  %4036 = vrcp.f32 %v1472_v37  ;;  %v1473_v46 = vadd.f32 1.0, %v4009_v1  ;;  %v1215_v6 = vpop.f32.mrf.mxu1 }
 0x1a4   : > { %v4013_v18 = vpop.eup %4012  ;;  %v1474_v60 = vadd.f32 1.0, %v4011_v40  ;;  %4038 = vpow2.f32 %v3334_v10  ;;  %v3335_v2 = vmul.f32 -1.442695, %v1215_v6  ;;  %v1701_v12 = vpack.c.bf16 %v1657_v55, %v1655_v57 }
 0x1a5   : > { %v4015_v3 = vpop.eup %4014  ;;  %4040 = vrcp.f32 %v1473_v46  ;;  %v1217_v25 = vpop.f32.mrf.mxu1  ;;  %v1658_v8 = vmul.f32 %v4013_v18, %v4594_v28 }
 0x1a6   : > { %v4017_v4 = vpop.eup %4016  ;;  %4042 = vrcp.f32 %v1474_v60  ;;  %v1475_v11 = vadd.f32 1.0, %v4015_v3  ;;  %v3336_v27 = vmul.f32 -1.442695, %v1217_v25  ;;  %1946 = vmatprep.mubr.bf16.mxu0 %v1701_v12 }
 0x1a7   : > { %v4019_v21 = vpop.eup %4018  ;;  %4044 = vpow2.f32 %v3335_v2  ;;  %v1219_v7 = vpop.f32.mrf.mxu1  ;;  %v1659_v49 = vmul.f32 %v4017_v4, %v4596_v29 }
 0x1a8   : > { %v4021_v22 = vpop.eup %4020  ;;  %4046 = vrcp.f32 %v1475_v11  ;;  %v1476_v24 = vadd.f32 1.0, %v4019_v21  ;;  %v3337_v58 = vmul.f32 -1.442695, %v1219_v7  ;;  %1947 = vmatmul.mubr.bf16.gmra.mxu0 %v1700_v26 }
 0x1a9   : > { %v4023_v15 = vpop.eup %4022  ;;  %4048 = vpow2.f32 %v3336_v27  ;;  %v1221_v59 = vpop.f32.mrf.mxu1  ;;  %v1660_v13 = vmul.f32 %v4021_v22, %v4598_v30 }
 0x1aa   : > { %v4025_v0 = vpop.eup %4024  ;;  %4050 = vrcp.f32 %v1476_v24  ;;  %v1477_v34 = vadd.f32 1.0, %v4023_v15  ;;  %v3338_v17 = vmul.f32 -1.442695, %v1221_v59 }
 0x1ab   : > { %v4027_v5 = vpop.eup %4026  ;;  %4052 = vpow2.f32 %v3337_v58  ;;  %v1225_v43 = vpop.f32.mrf.mxu1  ;;  %v1661_v52 = vmul.f32 %v4025_v0, %v4600_v31  ;;  %v1702_v37 = vpack.c.bf16 %v1660_v13, %v1658_v8 }
 0x1ac   : > { %v4029_v16 = vpop.eup %4028  ;;  %4054 = vrcp.f32 %v1477_v34  ;;  %v1478_v50 = vadd.f32 1.0, %v4027_v5  ;;  %v3339_v19 = vmul.f32 -1.442695, %v1225_v43 }
 0x1ad   : > { %v4031_v56 = vpop.eup %4030  ;;  %4056 = vpow2.f32 %v3338_v17  ;;  %v1227_v62 = vpop.f32.mrf.mxu1  ;;  %v1703_v61 = vpack.c.bf16 %v1661_v52, %v1659_v49  ;;  %v1662_v2 = vmul.f32 %v4029_v16, %v4602_v32 }
 0x1ae   : > { %v4033_v9 = vpop.eup %4032  ;;  %4058 = vrcp.f32 %v1478_v50  ;;  %v1479_v30 = vadd.f32 1.0, %v4031_v56  ;;  %v3340_v14 = vmul.f32 -1.442695, %v1227_v62 }
 0x1af   : > { %v4035_v20 = vpop.eup %4034  ;;  %4060 = vpow2.f32 %v3339_v19  ;;  %1954 = vmatprep.mubr.bf16.mxu0 %v1703_v61  ;;  %v1229_v29 = vpop.f32.mrf.mxu1  ;;  %v1663_v23 = vmul.f32 %v4033_v9, %v4604_v33 }
 0x1b0   : > { %v4037_v31 = vpop.eup %4036  ;;  %4062 = vrcp.f32 %v1479_v30  ;;  %v1480_v57 = vadd.f32 1.0, %v4035_v20  ;;  %v3341_v1 = vmul.f32 -1.442695, %v1229_v29  ;;  %1955 = vmatmul.mubr.bf16.gmra.mxu0 %v1702_v37  ;;  %v5398_v37 = vld [vmem:[#allocation2_spill] sm:$0xff] }
 0x1b1   : > { %v4039_v10 = vpop.eup %4038  ;;  %4064 = vpow2.f32 %v3340_v14  ;;  %v1231_v28 = vpop.f32.mrf.mxu1  ;;  %v1664_v46 = vmul.f32 %v4037_v31, %v4608_v35 }
 0x1b2   : > { %v4041_v55 = vpop.eup %4040  ;;  %4066 = vrcp.f32 %v1480_v57  ;;  %v1481_v63 = vadd.f32 1.0, %v4039_v10  ;;  %v3342_v40 = vmul.f32 -1.442695, %v1231_v28  ;;  %v5399_v28 = vld [vmem:[#allocation5_spill] sm:$0xff] }
 0x1b3   : > { %v4043_v6 = vpop.eup %4042  ;;  %4068 = vpow2.f32 %v3341_v1  ;;  %v1665_v18 = vmul.f32 %v4041_v55, %v4610_v36  ;;  %v1704_v4 = vpack.c.bf16 %v1664_v46, %v1662_v2  ;;  %v5401_v46 = vld [vmem:[#allocation6_spill] sm:$0xff] }
 0x1b4   : > { %v4045_v60 = vpop.eup %4044  ;;  %4070 = vrcp.f32 %v1481_v63  ;;  %v1666_v0 = vmul.f32 %v4043_v6, %v4614_v38  ;;  %v5400_v63 = vld [vmem:[#allocation4_spill] sm:$0xff]  ;;  %v5402_v6 = vld [vmem:[#allocation3_spill] sm:$0xff] }
 0x1b5   : > { %v4047_v12 = vpop.eup %4046  ;;  %4072 = vpow2.f32 %v3342_v40  ;;  %v1705_v3 = vpack.c.bf16 %v1665_v18, %v1663_v23  ;;  %v1482_v35 = vadd.f32 1.0, %v4045_v60 }
 0x1b6   : > { %v4049_v25 = vpop.eup %4048  ;;  %v1667_v36 = vmul.f32 %v4047_v12, %v4616_v39 }
 0x1b7   : > { %v4051_v11 = vpop.eup %4050  ;;  %v1483_v27 = vadd.f32 1.0, %v4049_v25  ;;  %1962 = vmatprep.mubr.bf16.mxu0 %v1705_v3 }
 0x1b8   : > { %v4053_v26 = vpop.eup %4052  ;;  %1963 = vmatmul.mubr.bf16.gmra.mxu0 %v1704_v4  ;;  %v1668_v32 = vmul.f32 %v4051_v11, %v4620_v41 }
 0x1b9   : > { %v4055_v21 = vpop.eup %4054  ;;  %v1484_v7 = vadd.f32 1.0, %v4053_v26  ;;  %4074 = vrcp.f32 %v1483_v27 }
 0x1ba   : > { %v4057_v33 = vpop.eup %4056  ;;  %v1669_v22 = vmul.f32 %v4055_v21, %v4622_v42  ;;  %v1706_v13 = vpack.c.bf16 %v1668_v32, %v1666_v0 }
 0x1bb   : > { %v4059_v24 = vpop.eup %4058  ;;  %4076 = vrcp.f32 %v1484_v7  ;;  %v1485_v58 = vadd.f32 1.0, %v4057_v33 }
 0x1bc   : > { %v4061_v15 = vpop.eup %4060  ;;  %4078 = vrcp.f32 %v1482_v35  ;;  %v1707_v59 = vpack.c.bf16 %v1669_v22, %v1667_v36  ;;  %v1670_v56 = vmul.f32 %v4059_v24, %v4626_v44 }
 0x1bd   : > { %v4063_v34 = vpop.eup %4062  ;;  %4080 = vrcp.f32 %v1485_v58  ;;  %v1486_v49 = vadd.f32 1.0, %v4061_v15 }
 0x1be   : > { %v4065_v17 = vpop.eup %4064  ;;  %1970 = vmatprep.mubr.bf16.mxu0 %v1707_v59  ;;  %v1671_v16 = vmul.f32 %v4063_v34, %v4628_v45 }
 0x1bf   : > { %v4067_v5 = vpop.eup %4066  ;;  %v1487_v43 = vadd.f32 1.0, %v4065_v17 }
 0x1c0   : > { %v4069_v39 = vpop.eup %4068  ;;  %1971 = vmatmul.mubr.bf16.gmra.mxu0 %v1706_v13  ;;  %v1672_v38 = vmul.f32 %v4067_v5, %v4632_v47 }
 0x1c1   : > { %v4071_v42 = vpop.eup %4070  ;;  %v1488_v41 = vadd.f32 1.0, %v4069_v39  ;;  %4082 = vrcp.f32 %v1487_v43 }
 0x1c2   : > { %v4073_v52 = vpop.eup %4072  ;;  %v1673_v50 = vmul.f32 %v4071_v42, %v4634_v48  ;;  %v1708_v62 = vpack.c.bf16 %v1672_v38, %v1670_v56 }
 0x1c3   : > { %4084 = vrcp.f32 %v1488_v41  ;;  %v1489_v19 = vadd.f32 1.0, %v4073_v52 }
 0x1c4   : > { %4086 = vrcp.f32 %v1486_v49  ;;  %v1709_v8 = vpack.c.bf16 %v1673_v50, %v1671_v16 }
 0x1c5   : > { %4088 = vrcp.f32 %v1489_v19 }
 0x1c6   : > { %1978 = vmatprep.mubr.bf16.mxu0 %v1709_v8  ;;  %v4075_v61 = vpop.eup %4074 }
 0x1c7   : > { %v1675_v48 = vmul.f32 %v4075_v61, %v4640_v51 }
 0x1c8   : > { %v4077_v9 = vpop.eup %4076  ;;  %1979 = vmatmul.mubr.bf16.gmra.mxu0 %v1708_v62 }
 0x1c9   : > { %v4079_v30 = vpop.eup %4078  ;;  %v1676_v45 = vmul.f32 %v4077_v9, %v4644_v53 }
 0x1ca   : > { %v4081_v14 = vpop.eup %4080  ;;  %v1674_v20 = vmul.f32 %v4079_v30, %v5398_v37 }
 0x1cb   : > { %v1677_v47 = vmul.f32 %v4081_v14, %v4646_v54 }
 0x1cc   : > { %v1710_v31 = vpack.c.bf16 %v1676_v45, %v1674_v20 }
 0x1cd   : > { %v1711_v29 = vpack.c.bf16 %v1677_v47, %v1675_v48 }
 0x1ce   : > { %v4083_v57 = vpop.eup %4082 }
 0x1cf   : > { %1986 = vmatprep.mubr.bf16.mxu0 %v1711_v29  ;;  %v1679_v40 = vmul.f32 %v4083_v57, %v5400_v63 }
 0x1d0   : > { %v4085_v44 = vpop.eup %4084  ;;  %1987 = vmatmul.mubr.bf16.gmra.mxu0 %v1710_v31 }
 0x1d1   : > { %v4087_v1 = vpop.eup %4086  ;;  %v1680_v55 = vmul.f32 %v4085_v44, %v5399_v28 }
 0x1d2   : > { %v4089_v10 = vpop.eup %4088  ;;  %v1678_v51 = vmul.f32 %v4087_v1, %v5402_v6 }
 0x1d3   : > { %v1681_v53 = vmul.f32 %v4089_v10, %v5401_v46 }
 0x1d4   : > { %v1712_v54 = vpack.c.bf16 %v1680_v55, %v1678_v51 }
 0x1d5   : > { %v1713_v23 = vpack.c.bf16 %v1681_v53, %v1679_v40 }
 0x1d7   : > { %1994 = vmatprep.mubr.bf16.mxu0 %v1713_v23 }
 0x1d8   : > { %1995 = vmatmul.mubr.bf16.gmra.mxu0 %v1712_v54 }
 0x21f   : > { %v3462_v18 = vpop.f32.mrf.mxu0 }
 0x221   : > { %v3463_v60 = vpop.f32.mrf.mxu0 }
 0x222   : > { %v4763_v2 = vadd.f32 %v3463_v60, %v3462_v18 }
 0x223   : > { %v3465_v12 = vpop.f32.mrf.mxu0 }
 0x225   : > { %v3466_v3 = vpop.f32.mrf.mxu0 }
 0x226   : > { %v4765_v25 = vadd.f32 %v3466_v3, %v3465_v12 }
 0x227   : > { %v3468_v4 = vpop.f32.mrf.mxu0 }
 0x229   : > { %v3469_v11 = vpop.f32.mrf.mxu0 }
 0x22a   : > { %v4767_v27 = vadd.f32 %v3469_v11, %v3468_v4 }
 0x22b   : > { %v3471_v26 = vpop.f32.mrf.mxu0 }
 0x22d   : > { %v3472_v35 = vpop.f32.mrf.mxu0 }
 0x22e   : > { %v4769_v21 = vadd.f32 %v3472_v35, %v3471_v26 }
 0x230   : > { %v3474_v7 = vpop.f32.mrf.mxu0 }
 0x232   : > { %v3475_v33 = vpop.f32.mrf.mxu0 }
 0x233   : > { %v4771_v36 = vadd.f32 %v3475_v33, %v3474_v7 }
 0x234   : > { %v3477_v22 = vpop.f32.mrf.mxu0 }
 0x236   : > { %v3478_v32 = vpop.f32.mrf.mxu0 }
 0x237   : > { %v4773_v24 = vadd.f32 %v3478_v32, %v3477_v22 }
 0x238   : > { %v3480_v58 = vpop.f32.mrf.mxu0 }
 0x23a   : > { %v3481_v15 = vpop.f32.mrf.mxu0 }
 0x23b   : > { %v4775_v59 = vadd.f32 %v3481_v15, %v3480_v58 }
 0x23c   : > { %v3483_v0 = vpop.f32.mrf.mxu0 }
 0x23e   : > { %v3484_v34 = vpop.f32.mrf.mxu0 }
 0x23f   : > { %v4777_v17 = vadd.f32 %v3484_v34, %v3483_v0 }
 0x240   : > { %v3486_v13 = vpop.f32.mrf.mxu0 }
 0x242   : > { %v3487_v5 = vpop.f32.mrf.mxu0 }
 0x243   : > { %v4779_v43 = vadd.f32 %v3487_v5, %v3486_v13 }
 0x244   : > { %v3489_v39 = vpop.f32.mrf.mxu0 }
 0x245   : > { %v2027_v49 = vsel %vm799_vm0, %v4779_v43, 0.0 }
 0x246   : > { %v3490_v42 = vpop.f32.mrf.mxu0  ;;  %2028 = vadd.xlane.f32.xlu0 %v2027_v49 }
 0x247   : > { %v4783_v41 = vadd.f32 %v3490_v42, %v3489_v39 }
 0x248   : > { %v3492_v52 = vpop.f32.mrf.mxu0 }
 0x249   : > { %v2030_v16 = vsel %vm799_vm0, %v4783_v41, 0.0 }
 0x24a   : > { %v3493_v50 = vpop.f32.mrf.mxu0  ;;  %2031 = vadd.xlane.f32.xlu0 %v2030_v16 }
 0x24b   : > { %v4787_v38 = vadd.f32 %v3493_v50, %v3492_v52 }
 0x24c   : > { %v3495_v19 = vpop.f32.mrf.mxu0 }
 0x24d   : > { %v2033_v8 = vsel %vm799_vm0, %v4787_v38, 0.0 }
 0x24e   : > { %v3496_v56 = vpop.f32.mrf.mxu0  ;;  %2034 = vadd.xlane.f32.xlu1 %v2033_v8 }
 0x24f   : > { %v4791_v62 = vadd.f32 %v3496_v56, %v3495_v19 }
 0x250   : > { %v3498_v61 = vpop.f32.mrf.mxu0 }
 0x251   : > { %v2036_v9 = vsel %vm799_vm0, %v4791_v62, 0.0 }
 0x252   : > { %v3499_v30 = vpop.f32.mrf.mxu0  ;;  %2037 = vadd.xlane.f32.xlu1 %v2036_v9 }
 0x253   : > { %v4795_v14 = vadd.f32 %v3499_v30, %v3498_v61 }
 0x254   : > { %v3501_v45 = vpop.f32.mrf.mxu0 }
 0x255   : > { %v2039_v48 = vsel %vm799_vm0, %v4795_v14, 0.0 }
 0x256   : > { %v3502_v47 = vpop.f32.mrf.mxu0  ;;  %2040 = vadd.xlane.f32.xlu0 %v2039_v48 }
 0x257   : > { %v4799_v37 = vadd.f32 %v3502_v47, %v3501_v45 }
 0x258   : > { %v3504_v20 = vpop.f32.mrf.mxu0 }
 0x259   : > { %v2042_v29 = vsel %vm799_vm0, %v4799_v37, 0.0 }
 0x25a   : > { %v3505_v31 = vpop.f32.mrf.mxu0  ;;  %2043 = vadd.xlane.f32.xlu1 %v2042_v29 }
 0x25b   : > { %v4803_v57 = vadd.f32 %v3505_v31, %v3504_v20 }
 0x25c   : > { %v3507_v44 = vpop.f32.mrf.mxu0 }
 0x25d   : > { %v2045_v1 = vsel %vm799_vm0, %v4803_v57, 0.0 }
 0x25e   : > { %v3508_v10 = vpop.f32.mrf.mxu0  ;;  %2046 = vadd.xlane.f32.xlu0 %v2045_v1 }
 0x25f   : > { %v4807_v28 = vadd.f32 %v3508_v10, %v3507_v44 }
 0x260   : > { %v3510_v55 = vpop.f32.mrf.mxu0 }
 0x261   : > { %v2048_v63 = vsel %vm799_vm0, %v4807_v28, 0.0 }
 0x262   : > { %2049 = vadd.xlane.f32.xlu1 %v2048_v63  ;;  %v3511_v40 = vpop.f32.mrf.mxu0 }
 0x263   : > { %v4811_v46 = vadd.f32 %v3511_v40, %v3510_v55 }
 0x264   : > { %v3513_v53 = vpop.f32.mrf.mxu0 }
 0x265   : > { %v2051_v6 = vsel %vm799_vm0, %v4811_v46, 0.0 }
 0x266   : > { %v3514_v51 = vpop.f32.mrf.mxu0  ;;  %2052 = vadd.xlane.f32.xlu0 %v2051_v6 }
 0x267   : > { %v4815_v23 = vadd.f32 %v3514_v51, %v3513_v53 }
 0x268   : > { %v3516_v54 = vpop.f32.mrf.mxu0 }
 0x269   : > { %v2054_v18 = vsel %vm799_vm0, %v4815_v23, 0.0 }
 0x26a   : > { %v3517_v60 = vpop.f32.mrf.mxu0  ;;  %2055 = vadd.xlane.f32.xlu1 %v2054_v18 }
 0x26b   : > { %v4819_v12 = vadd.f32 %v3517_v60, %v3516_v54 }
 0x26c   : > { %v3519_v3 = vpop.f32.mrf.mxu0 }
 0x26d   : > { %v2057_v4 = vsel %vm799_vm0, %v4819_v12, 0.0 }
 0x26e   : > { %v3520_v11 = vpop.f32.mrf.mxu0  ;;  %2058 = vadd.xlane.f32.xlu0 %v2057_v4 }
 0x26f   : > { %v4823_v26 = vadd.f32 %v3520_v11, %v3519_v3 }
 0x270   : > { %v3522_v35 = vpop.f32.mrf.mxu0 }
 0x271   : > { %v2060_v7 = vsel %vm799_vm0, %v4823_v26, 0.0 }
 0x272   : > { %v3523_v33 = vpop.f32.mrf.mxu0  ;;  %2061 = vadd.xlane.f32.xlu1 %v2060_v7 }
 0x273   : > { %v4827_v22 = vadd.f32 %v3523_v33, %v3522_v35 }
 0x274   : > { %v3525_v32 = vpop.f32.mrf.mxu0 }
 0x275   : > { %v2063_v58 = vsel %vm799_vm0, %v4827_v22, 0.0 }
 0x276   : > { %v3526_v15 = vpop.f32.mrf.mxu0  ;;  %2064 = vadd.xlane.f32.xlu0 %v2063_v58 }
 0x277   : > { %v4831_v0 = vadd.f32 %v3526_v15, %v3525_v32  ;;  %v2003_v15 = vsel %vm799_vm0, %v4763_v2, 0.0 }
 0x278   : > { %v3528_v34 = vpop.f32.mrf.mxu0 }
 0x279   : > { %v2066_v13 = vsel %vm799_vm0, %v4831_v0, 0.0 }
 0x27a   : > { %v3529_v5 = vpop.f32.mrf.mxu0  ;;  %2067 = vadd.xlane.f32.xlu1 %v2066_v13  ;;  %v2009_v13 = vsel %vm799_vm0, %v4767_v27, 0.0 }
 0x27b   : > { %v4835_v39 = vadd.f32 %v3529_v5, %v3528_v34  ;;  %v2006_v34 = vsel %vm799_vm0, %v4765_v25, 0.0  ;;  %v2012_v5 = vsel %vm799_vm0, %v4769_v21, 0.0 }
 0x27c   : > { %v3531_v49 = vpop.f32.mrf.mxu0 }
 0x27d   : > { %v2069_v42 = vsel %vm799_vm0, %v4835_v39, 0.0 }
 0x27e   : > { %v3532_v52 = vpop.f32.mrf.mxu0  ;;  %2070 = vadd.xlane.f32.xlu0 %v2069_v42  ;;  %v2018_v42 = vsel %vm799_vm0, %v4773_v24, 0.0 }
 0x27f   : > { %v4839_v16 = vadd.f32 %v3532_v52, %v3531_v49  ;;  %v2015_v49 = vsel %vm799_vm0, %v4771_v36, 0.0  ;;  %v2021_v52 = vsel %vm799_vm0, %v4775_v59, 0.0 }
 0x280   : > { %v3534_v50 = vpop.f32.mrf.mxu0 }
 0x281   : > { %v2072_v19 = vsel %vm799_vm0, %v4839_v16, 0.0 }
 0x282   : > { %v3535_v8 = vpop.f32.mrf.mxu0  ;;  %2073 = vadd.xlane.f32.xlu1 %v2072_v19 }
 0x283   : > { %v4843_v56 = vadd.f32 %v3535_v8, %v3534_v50  ;;  %v2024_v50 = vsel %vm799_vm0, %v4777_v17, 0.0 }
 0x284   : > { %v3537_v61 = vpop.f32.mrf.mxu0 }
 0x285   : > { %v2075_v9 = vsel %vm799_vm0, %v4843_v56, 0.0 }
 0x286   : > { %v3538_v30 = vpop.f32.mrf.mxu0  ;;  %2076 = vadd.xlane.f32.xlu0 %v2075_v9 }
 0x287   : > { %v4847_v45 = vadd.f32 %v3538_v30, %v3537_v61 }
 0x288   : > { %v3540_v48 = vpop.f32.mrf.mxu0 }
 0x289   : > { %v2078_v47 = vsel %vm799_vm0, %v4847_v45, 0.0 }
 0x28a   : > { %v3541_v20 = vpop.f32.mrf.mxu0  ;;  %2079 = vadd.xlane.f32.xlu1 %v2078_v47 }
 0x28b   : > { %v4851_v29 = vadd.f32 %v3541_v20, %v3540_v48 }
 0x28c   : > { %v3543_v31 = vpop.f32.mrf.mxu0 }
 0x28d   : > { %v2081_v44 = vsel %vm799_vm0, %v4851_v29, 0.0 }
 0x28e   : > { %v3544_v1 = vpop.f32.mrf.mxu0  ;;  %2082 = vadd.xlane.f32.xlu0 %v2081_v44 }
 0x28f   : > { %v4855_v10 = vadd.f32 %v3544_v1, %v3543_v31 }
 0x290   : > { %v3546_v55 = vpop.f32.mrf.mxu0 }
 0x291   : > { %v2084_v63 = vsel %vm799_vm0, %v4855_v10, 0.0 }
 0x292   : > { %v3547_v40 = vpop.f32.mrf.mxu0  ;;  %2085 = vadd.xlane.f32.xlu1 %v2084_v63 }
 0x293   : > { %v4859_v53 = vadd.f32 %v3547_v40, %v3546_v55 }
 0x294   : > { %v3549_v6 = vpop.f32.mrf.mxu0 }
 0x295   : > { %v2087_v51 = vsel %vm799_vm0, %v4859_v53, 0.0 }
 0x296   : > { %v3550_v54 = vpop.f32.mrf.mxu0  ;;  %2088 = vadd.xlane.f32.xlu0 %v2087_v51 }
 0x297   : > { %v4863_v18 = vadd.f32 %v3550_v54, %v3549_v6 }
 0x298   : > { %v3552_v60 = vpop.f32.mrf.mxu0 }
 0x299   : > { %v2090_v3 = vsel %vm799_vm0, %v4863_v18, 0.0 }
 0x29a   : > { %v3553_v4 = vpop.f32.mrf.mxu0  ;;  %2091 = vadd.xlane.f32.xlu1 %v2090_v3 }
 0x29b   : > { %v4867_v11 = vadd.f32 %v3553_v4, %v3552_v60 }
 0x29c   : > { %v3555_v35 = vpop.f32.mrf.mxu0 }
 0x29d   : > { %v2093_v7 = vsel %vm799_vm0, %v4867_v11, 0.0 }
 0x29e   : > { %v3556_v33 = vpop.f32.mrf.mxu0  ;;  %2094 = vadd.xlane.f32.xlu0 %v2093_v7 }
 0x29f   : > { %v4871_v32 = vadd.f32 %v3556_v33, %v3555_v35 }
 0x2a1   : > { %v2096_v58 = vsel %vm799_vm0, %v4871_v32, 0.0 }
 0x2a2   : > { %2097 = vadd.xlane.f32.xlu1 %v2096_v58  ;;  %2004 = vadd.xlane.f32.xlu0 %v2003_v15 }
 0x2a6   : > { %2007 = vadd.xlane.f32.xlu1 %v2006_v34  ;;  %2010 = vadd.xlane.f32.xlu0 %v2009_v13 }
 0x2aa   : > { %2013 = vadd.xlane.f32.xlu1 %v2012_v5  ;;  %2016 = vadd.xlane.f32.xlu0 %v2015_v49 }
 0x2ae   : > { %2019 = vadd.xlane.f32.xlu1 %v2018_v42  ;;  %2022 = vadd.xlane.f32.xlu0 %v2021_v52 }
 0x2b2   : > { %2025 = vadd.xlane.f32.xlu1 %v2024_v50 }
 0x2cf   : > { %v2029_v19 = vpop.xlane.xlu0 %2028 }
 0x2d0   : > { %v2108_v8 = vmul.f32 0.03125, %v2029_v19 }
 0x2d2   : > { %v4892_v61 = vsub.f32 %v4779_v43, %v2108_v8 }
 0x2d3   : > { %v2032_v9 = vpop.xlane.xlu0 %2031 }
 0x2d4   : > { %v2109_v30 = vmul.f32 0.03125, %v2032_v9  ;;  %v2172_v48 = vmul.f32 %v4892_v61, %v4892_v61 }
 0x2d6   : > { %v4897_v47 = vsub.f32 %v4783_v41, %v2109_v30  ;;  %v2220_v20 = vsel %vm799_vm0, %v2172_v48, 0.0 }
 0x2d7   : > { %v2035_v31 = vpop.xlane.xlu1 %2034  ;;  %2221 = vadd.xlane.f32.xlu0 %v2220_v20 }
 0x2d8   : > { %v2110_v44 = vmul.f32 0.03125, %v2035_v31  ;;  %v2173_v1 = vmul.f32 %v4897_v47, %v4897_v47 }
 0x2da   : > { %v4903_v55 = vsub.f32 %v4787_v38, %v2110_v44  ;;  %v2223_v43 = vsel %vm799_vm0, %v2173_v1, 0.0 }
 0x2db   : > { %v2038_v63 = vpop.xlane.xlu1 %2037  ;;  %2224 = vadd.xlane.f32.xlu1 %v2223_v43 }
 0x2dc   : > { %v2111_v40 = vmul.f32 0.03125, %v2038_v63  ;;  %v2174_v41 = vmul.f32 %v4903_v55, %v4903_v55 }
 0x2de   : > { %v4909_v6 = vsub.f32 %v4791_v62, %v2111_v40  ;;  %v2226_v51 = vsel %vm799_vm0, %v2174_v41, 0.0 }
 0x2df   : > { %v2041_v54 = vpop.xlane.xlu0 %2040  ;;  %2227 = vadd.xlane.f32.xlu0 %v2226_v51 }
 0x2e0   : > { %v2112_v60 = vmul.f32 0.03125, %v2041_v54  ;;  %v2175_v38 = vmul.f32 %v4909_v6, %v4909_v6 }
 0x2e2   : > { %v4915_v3 = vsub.f32 %v4795_v14, %v2112_v60  ;;  %v2229_v4 = vsel %vm799_vm0, %v2175_v38, 0.0 }
 0x2e3   : > { %v2044_v35 = vpop.xlane.xlu1 %2043  ;;  %2230 = vadd.xlane.f32.xlu1 %v2229_v4 }
 0x2e4   : > { %v2113_v7 = vmul.f32 0.03125, %v2044_v35  ;;  %v2176_v62 = vmul.f32 %v4915_v3, %v4915_v3 }
 0x2e6   : > { %v4921_v33 = vsub.f32 %v4799_v37, %v2113_v7  ;;  %v2232_v58 = vsel %vm799_vm0, %v2176_v62, 0.0 }
 0x2e7   : > { %v2047_v15 = vpop.xlane.xlu0 %2046  ;;  %2233 = vadd.xlane.f32.xlu0 %v2232_v58 }
 0x2e8   : > { %v2114_v34 = vmul.f32 0.03125, %v2047_v15  ;;  %v2177_v14 = vmul.f32 %v4921_v33, %v4921_v33 }
 0x2ea   : > { %v4927_v13 = vsub.f32 %v4803_v57, %v2114_v34  ;;  %v2235_v5 = vsel %vm799_vm0, %v2177_v14, 0.0 }
 0x2eb   : > { %v2050_v49 = vpop.xlane.xlu1 %2049  ;;  %2236 = vadd.xlane.f32.xlu1 %v2235_v5 }
 0x2ec   : > { %v2115_v42 = vmul.f32 0.03125, %v2050_v49  ;;  %v2178_v37 = vmul.f32 %v4927_v13, %v4927_v13 }
 0x2ee   : > { %v4933_v52 = vsub.f32 %v4807_v28, %v2115_v42  ;;  %v2238_v50 = vsel %vm799_vm0, %v2178_v37, 0.0 }
 0x2ef   : > { %2239 = vadd.xlane.f32.xlu0 %v2238_v50  ;;  %v2053_v19 = vpop.xlane.xlu0 %2052 }
 0x2f0   : > { %v2116_v8 = vmul.f32 0.03125, %v2053_v19  ;;  %v2179_v57 = vmul.f32 %v4933_v52, %v4933_v52 }
 0x2f2   : > { %v4939_v9 = vsub.f32 %v4811_v46, %v2116_v8  ;;  %v2241_v30 = vsel %vm799_vm0, %v2179_v57, 0.0 }
 0x2f3   : > { %2242 = vadd.xlane.f32.xlu1 %v2241_v30  ;;  %v2056_v48 = vpop.xlane.xlu1 %2055 }
 0x2f4   : > { %v2117_v20 = vmul.f32 0.03125, %v2056_v48  ;;  %v2180_v28 = vmul.f32 %v4939_v9, %v4939_v9 }
 0x2f6   : > { %v4945_v31 = vsub.f32 %v4815_v23, %v2117_v20  ;;  %v2244_v44 = vsel %vm799_vm0, %v2180_v28, 0.0 }
 0x2f7   : > { %2245 = vadd.xlane.f32.xlu0 %v2244_v44  ;;  %v2059_v1 = vpop.xlane.xlu0 %2058 }
 0x2f8   : > { %v2118_v43 = vmul.f32 0.03125, %v2059_v1  ;;  %v2181_v46 = vmul.f32 %v4945_v31, %v4945_v31 }
 0x2fa   : > { %v4951_v63 = vsub.f32 %v4819_v12, %v2118_v43  ;;  %v2247_v40 = vsel %vm799_vm0, %v2181_v46, 0.0 }
 0x2fb   : > { %2248 = vadd.xlane.f32.xlu1 %v2247_v40  ;;  %v2062_v41 = vpop.xlane.xlu1 %2061 }
 0x2fc   : > { %v2119_v51 = vmul.f32 0.03125, %v2062_v41  ;;  %v2182_v23 = vmul.f32 %v4951_v63, %v4951_v63 }
 0x2fe   : > { %v4957_v54 = vsub.f32 %v4823_v26, %v2119_v51  ;;  %v2250_v60 = vsel %vm799_vm0, %v2182_v23, 0.0 }
 0x2ff   : > { %2251 = vadd.xlane.f32.xlu0 %v2250_v60  ;;  %v2065_v38 = vpop.xlane.xlu0 %2064 }
 0x300   : > { %v2120_v4 = vmul.f32 0.03125, %v2065_v38  ;;  %v2183_v12 = vmul.f32 %v4957_v54, %v4957_v54 }
 0x302   : > { %v4963_v35 = vsub.f32 %v4827_v22, %v2120_v4  ;;  %v2253_v7 = vsel %vm799_vm0, %v2183_v12, 0.0 }
 0x303   : > { %2254 = vadd.xlane.f32.xlu1 %v2253_v7  ;;  %v2068_v62 = vpop.xlane.xlu1 %2067 }
 0x304   : > { %v2121_v58 = vmul.f32 0.03125, %v2068_v62  ;;  %v2184_v26 = vmul.f32 %v4963_v35, %v4963_v35 }
 0x306   : > { %v4969_v15 = vsub.f32 %v4831_v0, %v2121_v58  ;;  %v2256_v34 = vsel %vm799_vm0, %v2184_v26, 0.0 }
 0x307   : > { %2257 = vadd.xlane.f32.xlu0 %v2256_v34  ;;  %v2071_v14 = vpop.xlane.xlu0 %2070 }
 0x308   : > { %v2122_v5 = vmul.f32 0.03125, %v2071_v14  ;;  %v2185_v22 = vmul.f32 %v4969_v15, %v4969_v15 }
 0x30a   : > { %v4975_v49 = vsub.f32 %v4835_v39, %v2122_v5  ;;  %v2259_v42 = vsel %vm799_vm0, %v2185_v22, 0.0 }
 0x30b   : > { %2260 = vadd.xlane.f32.xlu1 %v2259_v42  ;;  %v2074_v37 = vpop.xlane.xlu1 %2073 }
 0x30c   : > { %v2123_v50 = vmul.f32 0.03125, %v2074_v37  ;;  %v2186_v0 = vmul.f32 %v4975_v49, %v4975_v49 }
 0x30e   : > { %v4981_v19 = vsub.f32 %v4839_v16, %v2123_v50  ;;  %v2262_v8 = vsel %vm799_vm0, %v2186_v0, 0.0 }
 0x30f   : > { %2263 = vadd.xlane.f32.xlu0 %v2262_v8  ;;  %v2077_v57 = vpop.xlane.xlu0 %2076 }
 0x310   : > { %v2124_v30 = vmul.f32 0.03125, %v2077_v57  ;;  %v2187_v39 = vmul.f32 %v4981_v19, %v4981_v19 }
 0x312   : > { %v4987_v48 = vsub.f32 %v4843_v56, %v2124_v30  ;;  %v2265_v20 = vsel %vm799_vm0, %v2187_v39, 0.0 }
 0x313   : > { %2266 = vadd.xlane.f32.xlu1 %v2265_v20  ;;  %v2080_v28 = vpop.xlane.xlu1 %2079 }
 0x314   : > { %v2125_v44 = vmul.f32 0.03125, %v2080_v28  ;;  %v2188_v16 = vmul.f32 %v4987_v48, %v4987_v48 }
 0x316   : > { %v4993_v1 = vsub.f32 %v4847_v45, %v2125_v44  ;;  %v2268_v43 = vsel %vm799_vm0, %v2188_v16, 0.0 }
 0x317   : > { %2269 = vadd.xlane.f32.xlu0 %v2268_v43  ;;  %v2083_v46 = vpop.xlane.xlu0 %2082 }
 0x318   : > { %v2126_v40 = vmul.f32 0.03125, %v2083_v46  ;;  %v2189_v56 = vmul.f32 %v4993_v1, %v4993_v1 }
 0x31a   : > { %v4999_v41 = vsub.f32 %v4851_v29, %v2126_v40  ;;  %v2271_v51 = vsel %vm799_vm0, %v2189_v56, 0.0 }
 0x31b   : > { %2272 = vadd.xlane.f32.xlu1 %v2271_v51  ;;  %v2086_v23 = vpop.xlane.xlu1 %2085 }
 0x31c   : > { %v2127_v60 = vmul.f32 0.03125, %v2086_v23  ;;  %v2190_v45 = vmul.f32 %v4999_v41, %v4999_v41 }
 0x31e   : > { %v5005_v38 = vsub.f32 %v4855_v10, %v2127_v60  ;;  %v2274_v4 = vsel %vm799_vm0, %v2190_v45, 0.0 }
 0x31f   : > { %2275 = vadd.xlane.f32.xlu0 %v2274_v4  ;;  %v2089_v12 = vpop.xlane.xlu0 %2088 }
 0x320   : > { %v2128_v7 = vmul.f32 0.03125, %v2089_v12  ;;  %v2191_v29 = vmul.f32 %v5005_v38, %v5005_v38 }
 0x322   : > { %v5011_v62 = vsub.f32 %v4859_v53, %v2128_v7  ;;  %v2277_v58 = vsel %vm799_vm0, %v2191_v29, 0.0 }
 0x323   : > { %2278 = vadd.xlane.f32.xlu1 %v2277_v58  ;;  %v2092_v26 = vpop.xlane.xlu1 %2091 }
 0x324   : > { %v2129_v34 = vmul.f32 0.03125, %v2092_v26  ;;  %v2192_v10 = vmul.f32 %v5011_v62, %v5011_v62 }
 0x326   : > { %v5017_v14 = vsub.f32 %v4863_v18, %v2129_v34  ;;  %v2280_v5 = vsel %vm799_vm0, %v2192_v10, 0.0 }
 0x327   : > { %2281 = vadd.xlane.f32.xlu0 %v2280_v5  ;;  %v2095_v22 = vpop.xlane.xlu0 %2094 }
 0x328   : > { %v2130_v42 = vmul.f32 0.03125, %v2095_v22  ;;  %v2193_v53 = vmul.f32 %v5017_v14, %v5017_v14 }
 0x32a   : > { %v5023_v37 = vsub.f32 %v4867_v11, %v2130_v42  ;;  %v2283_v50 = vsel %vm799_vm0, %v2193_v53, 0.0 }
 0x32b   : > { %2284 = vadd.xlane.f32.xlu1 %v2283_v50  ;;  %v2098_v0 = vpop.xlane.xlu1 %2097  ;;  %v2005_v8 = vpop.xlane.xlu0 %2004 }
 0x32c   : > { %v2131_v57 = vmul.f32 0.03125, %v2098_v0  ;;  %v2100_v30 = vmul.f32 0.03125, %v2005_v8  ;;  %v2194_v18 = vmul.f32 %v5023_v37, %v5023_v37 }
 0x32e   : > { %v5029_v39 = vsub.f32 %v4871_v32, %v2131_v57  ;;  %v5032_v20 = vsub.f32 %v4763_v2, %v2100_v30  ;;  %v2286_v28 = vsel %vm799_vm0, %v2194_v18, 0.0 }
 0x32f   : > { %v2008_v11 = vpop.xlane.xlu1 %2007  ;;  %2287 = vadd.xlane.f32.xlu0 %v2286_v28  ;;  %v2011_v44 = vpop.xlane.xlu0 %2010 }
 0x330   : > { %v2101_v16 = vmul.f32 0.03125, %v2008_v11  ;;  %v2102_v43 = vmul.f32 0.03125, %v2011_v44  ;;  %v2195_v46 = vmul.f32 %v5029_v39, %v5029_v39  ;;  %v2164_v40 = vmul.f32 %v5032_v20, %v5032_v20 }
 0x332   : > { %v5040_v56 = vsub.f32 %v4765_v25, %v2101_v16  ;;  %v5043_v32 = vsub.f32 %v4767_v27, %v2102_v43  ;;  %v2289_v2 = vsel %vm799_vm0, %v2195_v46, 0.0  ;;  %v2196_v51 = vsel %vm799_vm0, %v2164_v40, 0.0 }
 0x333   : > { %2290 = vadd.xlane.f32.xlu1 %v2289_v2  ;;  %v2014_v23 = vpop.xlane.xlu1 %2013  ;;  %2197 = vadd.xlane.f32.xlu0 %v2196_v51  ;;  %v2017_v60 = vpop.xlane.xlu0 %2016  ;;  %v3826_v51 = vld [vmem:[%s5087_s16 + $0x38] sm:$0xff]  }
 0x334   : > { %v2103_v45 = vmul.f32 0.03125, %v2014_v23  ;;  %v2104_v4 = vmul.f32 0.03125, %v2017_v60  ;;  %v2165_v12 = vmul.f32 %v5040_v56, %v5040_v56  ;;  %v2166_v25 = vmul.f32 %v5043_v32, %v5043_v32  ;;  %3570 = vmatprep.subr.bf16.mxu1 %v3826_v51 }
 0x335   : > { %3571 = vmatpush3.bf16.msra.mxu1 %v3826_v51 }
 0x336   : > { %v5052_v7 = vsub.f32 %v4769_v21, %v2103_v45  ;;  %v5055_v27 = vsub.f32 %v4771_v36, %v2104_v4  ;;  %v2199_v29 = vsel %vm799_vm0, %v2165_v12, 0.0  ;;  %v2202_v58 = vsel %vm799_vm0, %v2166_v25, 0.0 }
 0x337   : > { %2200 = vadd.xlane.f32.xlu1 %v2199_v29  ;;  %v2020_v26 = vpop.xlane.xlu1 %2019  ;;  %2203 = vadd.xlane.f32.xlu0 %v2202_v58  ;;  %v2023_v34 = vpop.xlane.xlu0 %2022 }
 0x338   : > { %v2105_v10 = vmul.f32 0.03125, %v2020_v26  ;;  %v2106_v5 = vmul.f32 0.03125, %v2023_v34  ;;  %v2167_v22 = vmul.f32 %v5052_v7, %v5052_v7  ;;  %v2168_v21 = vmul.f32 %v5055_v27, %v5055_v27  ;;  %v5098_v26 = vld [vmem:[%s363_s19] ss:$0 sm:$0xff] }
 0x33a   : > { %v5064_v42 = vsub.f32 %v4773_v24, %v2105_v10  ;;  %v5067_v36 = vsub.f32 %v4775_v59, %v2106_v5  ;;  %v2205_v53 = vsel %vm799_vm0, %v2167_v22, 0.0  ;;  %v2208_v50 = vsel %vm799_vm0, %v2168_v21, 0.0  ;;  %v5101_v22 = vld [vmem:[%s366_s26] ss:$0 sm:$0xff]  ;;  %v3827_v21 = vld [vmem:[%s5087_s16 + $0x30] sm:$0xff]  }
 0x33b   : > { %2206 = vadd.xlane.f32.xlu1 %v2205_v53  ;;  %v2026_v0 = vpop.xlane.xlu1 %2025  ;;  %2209 = vadd.xlane.f32.xlu0 %v2208_v50 }
 0x33c   : > { %v2107_v8 = vmul.f32 0.03125, %v2026_v0  ;;  %v2169_v57 = vmul.f32 %v5064_v42, %v5064_v42  ;;  %v2170_v30 = vmul.f32 %v5067_v36, %v5067_v36  ;;  %3572 = vmatprep.subr.bf16.mxu1 %v3827_v21 }
 0x33d   : > { %3573 = vmatpush3.bf16.msra.mxu1 %v3827_v21 }
 0x33e   : > { %v5076_v24 = vsub.f32 %v4777_v17, %v2107_v8  ;;  %v2211_v59 = vsel %vm799_vm0, %v2169_v57, 0.0  ;;  %v2214_v18 = vsel %vm799_vm0, %v2170_v30, 0.0 }
 0x33f   : > { %2212 = vadd.xlane.f32.xlu1 %v2211_v59  ;;  %2215 = vadd.xlane.f32.xlu0 %v2214_v18 }
 0x340   : > { %v2171_v28 = vmul.f32 %v5076_v24, %v5076_v24 }
 0x342   : > { %v2217_v11 = vsel %vm799_vm0, %v2171_v28, 0.0 }
 0x343   : > { %2218 = vadd.xlane.f32.xlu1 %v2217_v11  ;;  %v3828_v11 = vld [vmem:[%s5087_s16 + $0x28] sm:$0xff]  }
 0x344   : > { %3574 = vmatprep.subr.bf16.mxu1 %v3828_v11 }
 0x345   : > { %3575 = vmatpush3.bf16.msra.mxu1 %v3828_v11 }
 0x360   : > { %v2222_v44 = vpop.xlane.xlu0 %2221 }
 0x361   : > { %v2300_v16 = vmul.f32 0.03125, %v2222_v44 }
 0x363   : > { %v2332_v43 = vadd.f32 1e-05, %v2300_v16 }
 0x364   : > { %v2225_v46 = vpop.xlane.xlu1 %2224 }
 0x365   : > { %4090 = vrsqrt.f32 %v2332_v43  ;;  %v2301_v17 = vmul.f32 0.03125, %v2225_v46 }
 0x367   : > { %v2333_v40 = vadd.f32 1e-05, %v2301_v17 }
 0x368   : > { %v2228_v2 = vpop.xlane.xlu0 %2227 }
 0x369   : > { %4092 = vrsqrt.f32 %v2333_v40  ;;  %v2302_v23 = vmul.f32 0.03125, %v2228_v2 }
 0x36b   : > { %v2334_v60 = vadd.f32 1e-05, %v2302_v23 }
 0x36c   : > { %v2231_v45 = vpop.xlane.xlu1 %2230 }
 0x36d   : > { %4094 = vrsqrt.f32 %v2334_v60  ;;  %v2303_v4 = vmul.f32 0.03125, %v2231_v45 }
 0x36f   : > { %v2335_v12 = vadd.f32 1e-05, %v2303_v4 }
 0x370   : > { %v2234_v25 = vpop.xlane.xlu0 %2233 }
 0x371   : > { %4096 = vrsqrt.f32 %v2335_v12  ;;  %v2304_v29 = vmul.f32 0.03125, %v2234_v25 }
 0x372   : > { %v4091_v58 = vpop.eup %4090 }
 0x373   : > { %v2336_v34 = vadd.f32 1e-05, %v2304_v29  ;;  %v2396_v10 = vmul.f32 %v4091_v58, %v4892_v61 }
 0x374   : > { %v2237_v5 = vpop.xlane.xlu1 %2236 }
 0x375   : > { %4098 = vrsqrt.f32 %v2336_v34  ;;  %v2305_v53 = vmul.f32 0.03125, %v2237_v5  ;;  %v2435_v50 = vmul.f32 %v5098_v26, %v2396_v10 }
 0x376   : > { %v4093_v0 = vpop.eup %4092 }
 0x377   : > { %v2337_v8 = vadd.f32 1e-05, %v2305_v53  ;;  %v2397_v57 = vmul.f32 %v4093_v0, %v4897_v47  ;;  %v5107_v30 = vadd.f32 %v5101_v22, %v2435_v50 }
 0x378   : > { %v2240_v59 = vpop.xlane.xlu0 %2239 }
 0x379   : > { %4100 = vrsqrt.f32 %v2337_v8  ;;  %v2306_v61 = vmul.f32 0.03125, %v2240_v59  ;;  %v2436_v18 = vmul.f32 %v5098_v26, %v2397_v57  ;;  %v3369_v28 = vmul.f32 -1.442695, %v5107_v30 }
 0x37a   : > { %v4095_v44 = vpop.eup %4094 }
 0x37b   : > { %v2338_v16 = vadd.f32 1e-05, %v2306_v61  ;;  %v5113_v43 = vadd.f32 %v5101_v22, %v2436_v18  ;;  %4102 = vpow2.f32 %v3369_v28  ;;  %v2398_v47 = vmul.f32 %v4095_v44, %v4903_v55 }
 0x37c   : > { %v2243_v46 = vpop.xlane.xlu1 %2242 }
 0x37d   : > { %4104 = vrsqrt.f32 %v2338_v16  ;;  %v2307_v17 = vmul.f32 0.03125, %v2243_v46  ;;  %v3370_v40 = vmul.f32 -1.442695, %v5113_v43  ;;  %v2437_v2 = vmul.f32 %v5098_v26, %v2398_v47 }
 0x37e   : > { %v4097_v51 = vpop.eup %4096 }
 0x37f   : > { %v2339_v23 = vadd.f32 1e-05, %v2307_v17  ;;  %4106 = vpow2.f32 %v3370_v40  ;;  %v2399_v60 = vmul.f32 %v4097_v51, %v4909_v6  ;;  %v5120_v45 = vadd.f32 %v5101_v22, %v2437_v2 }
 0x380   : > { %v2246_v4 = vpop.xlane.xlu0 %2245 }
 0x381   : > { %4108 = vrsqrt.f32 %v2339_v23  ;;  %v2308_v55 = vmul.f32 0.03125, %v2246_v4  ;;  %v2438_v12 = vmul.f32 %v5098_v26, %v2399_v60  ;;  %v3371_v25 = vmul.f32 -1.442695, %v5120_v45 }
 0x382   : > { %v4099_v29 = vpop.eup %4098 }
 0x383   : > { %v2340_v58 = vadd.f32 1e-05, %v2308_v55  ;;  %v5125_v34 = vadd.f32 %v5101_v22, %v2438_v12  ;;  %4110 = vpow2.f32 %v3371_v25  ;;  %v2400_v10 = vmul.f32 %v4099_v29, %v4915_v3 }
 0x384   : > { %v2249_v5 = vpop.xlane.xlu1 %2248 }
 0x385   : > { %4112 = vrsqrt.f32 %v2340_v58  ;;  %v2309_v6 = vmul.f32 0.03125, %v2249_v5  ;;  %v3372_v21 = vmul.f32 -1.442695, %v5125_v34  ;;  %v2439_v53 = vmul.f32 %v5098_v26, %v2400_v10 }
 0x386   : > { %v4101_v50 = vpop.eup %4100 }
 0x387   : > { %v2341_v0 = vadd.f32 1e-05, %v2309_v6  ;;  %4114 = vpow2.f32 %v3372_v21  ;;  %v2401_v8 = vmul.f32 %v4101_v50, %v4921_v33  ;;  %v5132_v57 = vadd.f32 %v5101_v22, %v2439_v53 }
 0x388   : > { %v4103_v59 = vpop.eup %4102  ;;  %v2252_v61 = vpop.xlane.xlu0 %2251 }
 0x389   : > { %4116 = vrsqrt.f32 %v2341_v0  ;;  %v2310_v18 = vmul.f32 0.03125, %v2252_v61  ;;  %v2602_v3 = vadd.f32 1.0, %v4103_v59  ;;  %v2440_v28 = vmul.f32 %v5098_v26, %v2401_v8 }
 0x38a   : > { %v4105_v11 = vpop.eup %4104  ;;  %v3373_v44 = vmul.f32 -1.442695, %v5132_v57 }
 0x38b   : > { %v2342_v16 = vadd.f32 1e-05, %v2310_v18  ;;  %4118 = vrcp.f32 %v2602_v3  ;;  %v5137_v47 = vadd.f32 %v5101_v22, %v2440_v28  ;;  %v2402_v33 = vmul.f32 %v4105_v11, %v4927_v13  ;;  %v3829_v3 = vld [vmem:[%s5087_s16 + $0x20] sm:$0xff]  }
 0x38c   : > { %v4107_v46 = vpop.eup %4106  ;;  %v2255_v17 = vpop.xlane.xlu1 %2254  ;;  %4120 = vpow2.f32 %v3373_v44  ;;  %3576 = vmatprep.subr.bf16.mxu1 %v3829_v3 }
 0x38d   : > { %4122 = vrsqrt.f32 %v2342_v16  ;;  %v2311_v40 = vmul.f32 0.03125, %v2255_v17  ;;  %v2603_v2 = vadd.f32 1.0, %v4107_v46  ;;  %v3374_v51 = vmul.f32 -1.442695, %v5137_v47  ;;  %3577 = vmatpush3.bf16.msra.mxu1 %v3829_v3 }
 0x38e   : > { %v4109_v23 = vpop.eup %4108  ;;  %v2441_v60 = vmul.f32 %v5098_v26, %v2402_v33 }
 0x38f   : > { %v2343_v4 = vadd.f32 1e-05, %v2311_v40  ;;  %4124 = vrcp.f32 %v2603_v2  ;;  %v2403_v55 = vmul.f32 %v4109_v23, %v4933_v52 }
 0x390   : > { %v4111_v12 = vpop.eup %4110  ;;  %4126 = vpow2.f32 %v3374_v51  ;;  %v5144_v25 = vadd.f32 %v5101_v22, %v2441_v60  ;;  %v2258_v13 = vpop.xlane.xlu0 %2257 }
 0x391   : > { %4128 = vrsqrt.f32 %v2343_v4  ;;  %v2604_v29 = vadd.f32 1.0, %v4111_v12  ;;  %v2442_v58 = vmul.f32 %v5098_v26, %v2403_v55  ;;  %v2312_v53 = vmul.f32 0.03125, %v2258_v13 }
 0x392   : > { %v4113_v10 = vpop.eup %4112  ;;  %v3375_v5 = vmul.f32 -1.442695, %v5144_v25 }
 0x393   : > { %4130 = vrcp.f32 %v2604_v29  ;;  %v5149_v6 = vadd.f32 %v5101_v22, %v2442_v58  ;;  %v2404_v52 = vmul.f32 %v4113_v10, %v4939_v9  ;;  %v2344_v16 = vadd.f32 1e-05, %v2312_v53 }
 0x394   : > { %v4115_v21 = vpop.eup %4114  ;;  %v2261_v50 = vpop.xlane.xlu1 %2260  ;;  %4132 = vpow2.f32 %v3375_v5 }
 0x395   : > { %v2313_v0 = vmul.f32 0.03125, %v2261_v50  ;;  %v2605_v8 = vadd.f32 1.0, %v4115_v21  ;;  %v3376_v59 = vmul.f32 -1.442695, %v5149_v6  ;;  %v2443_v18 = vmul.f32 %v5098_v26, %v2404_v52 }
 0x396   : > { %v4117_v61 = vpop.eup %4116 }
 0x397   : > { %v2345_v28 = vadd.f32 1e-05, %v2313_v0  ;;  %4134 = vrcp.f32 %v2605_v8  ;;  %v2405_v11 = vmul.f32 %v4117_v61, %v4945_v31  ;;  %v5157_v9 = vadd.f32 %v5101_v22, %v2443_v18 }
 0x398   : > { %v4119_v44 = vpop.eup %4118  ;;  %v2264_v33 = vpop.xlane.xlu0 %2263  ;;  %4136 = vpow2.f32 %v3376_v59 }
 0x399   : > { %v4121_v46 = vpop.eup %4120  ;;  %4138 = vrsqrt.f32 %v2345_v28  ;;  %v2444_v17 = vmul.f32 %v5098_v26, %v2405_v11  ;;  %v2314_v2 = vmul.f32 0.03125, %v2264_v33  ;;  %v3377_v23 = vmul.f32 -1.442695, %v5157_v9 }
 0x39a   : > { %v4123_v40 = vpop.eup %4122  ;;  %v2606_v51 = vadd.f32 1.0, %v4121_v46  ;;  %4140 = vrsqrt.f32 %v2344_v16  ;;  %v2698_v12 = vmul.f32 %v4119_v44, %v5107_v30 }
 0x39b   : > { %v5162_v31 = vadd.f32 %v5101_v22, %v2444_v17  ;;  %v2406_v60 = vmul.f32 %v4123_v40, %v4951_v63  ;;  %v2346_v52 = vadd.f32 1e-05, %v2314_v2 }
 0x39c   : > { %v4125_v4 = vpop.eup %4124  ;;  %v2267_v55 = vpop.xlane.xlu1 %2266  ;;  %4142 = vrcp.f32 %v2606_v51 }
 0x39d   : > { %v4127_v13 = vpop.eup %4126  ;;  %v2315_v29 = vmul.f32 0.03125, %v2267_v55  ;;  %v2699_v58 = vmul.f32 %v4125_v4, %v5113_v43  ;;  %v3378_v10 = vmul.f32 -1.442695, %v5162_v31  ;;  %4144 = vpow2.f32 %v3377_v23  ;;  %v3830_v55 = vld [vmem:[%s5087_s16 + $0x18] sm:$0xff]  }
 0x39e   : > { %v4129_v5 = vpop.eup %4128  ;;  %v2607_v21 = vadd.f32 1.0, %v4127_v13  ;;  %v2445_v53 = vmul.f32 %v5098_v26, %v2406_v60  ;;  %3578 = vmatprep.subr.bf16.mxu1 %v3830_v55 }
 0x39f   : > { %v2347_v50 = vadd.f32 1e-05, %v2315_v29  ;;  %v3642_v63 = vpack.i.bf16 %v2699_v58, %v2698_v12  ;;  %4146 = vpow2.f32 %v3378_v10  ;;  %v2407_v0 = vmul.f32 %v4129_v5, %v4957_v54  ;;  %3579 = vmatpush3.bf16.msra.mxu1 %v3830_v55 }
 0x3a0   : > { %v4131_v8 = vpop.eup %4130  ;;  %v2270_v30 = vpop.xlane.xlu0 %2269  ;;  %4148 = vrcp.f32 %v2607_v21  ;;  %v5171_v59 = vadd.f32 %v5101_v22, %v2445_v53 }
 0x3a1   : > { %v4133_v43 = vpop.eup %4132  ;;  %4150 = vrsqrt.f32 %v2347_v50  ;;  %v2316_v61 = vmul.f32 0.03125, %v2270_v30  ;;  %3643 = vrot.lane.b32.xlu0 %v3642_v63, %s4306_s27  ;;  %v2446_v18 = vmul.f32 %v5098_v26, %v2407_v0  ;;  %v2700_v33 = vmul.f32 %v4131_v8, %v5120_v45 }
 0x3a2   : > { %v2608_v3 = vadd.f32 1.0, %v4133_v43  ;;  %v3379_v28 = vmul.f32 -1.442695, %v5171_v59  ;;  %4152 = vrsqrt.f32 %v2346_v52 }
 0x3a3   : > { %v2348_v11 = vadd.f32 1e-05, %v2316_v61  ;;  %v5177_v54 = vadd.f32 %v5101_v22, %v2446_v18 }
 0x3a4   : > { %v4135_v44 = vpop.eup %4134  ;;  %v2273_v16 = vpop.xlane.xlu1 %2272  ;;  %4154 = vrcp.f32 %v2608_v3 }
 0x3a5   : > { %v4137_v46 = vpop.eup %4136  ;;  %4156 = vrsqrt.f32 %v2348_v11  ;;  %v2317_v17 = vmul.f32 0.03125, %v2273_v16  ;;  %v2701_v40 = vmul.f32 %v4135_v44, %v5125_v34  ;;  %v3380_v2 = vmul.f32 -1.442695, %v5177_v54 }
 0x3a6   : > { %v4139_v51 = vpop.eup %4138  ;;  %v2609_v23 = vadd.f32 1.0, %v4137_v46  ;;  %4158 = vpow2.f32 %v3379_v28 }
 0x3a7   : > { %v2349_v60 = vadd.f32 1e-05, %v2317_v17  ;;  %v3647_v4 = vpack.i.bf16 %v2701_v40, %v2700_v33  ;;  %4160 = vpow2.f32 %v3380_v2  ;;  %v2409_v13 = vmul.f32 %v4139_v51, %v4969_v15  ;;  %v4141_v45 = vpop.eup %4140 }
 0x3a8   : > { %v2276_v12 = vpop.xlane.xlu0 %2275  ;;  %4162 = vrcp.f32 %v2609_v23  ;;  %v2408_v53 = vmul.f32 %v4141_v45, %v4963_v35 }
 0x3a9   : > { %4164 = vrsqrt.f32 %v2349_v60  ;;  %v2318_v29 = vmul.f32 0.03125, %v2276_v12  ;;  %3648 = vrot.lane.b32.xlu1 %v3647_v4, %s4306_s27  ;;  %v4143_v34 = vpop.eup %4142  ;;  %v2448_v50 = vmul.f32 %v5098_v26, %v2409_v13 }
 0x3aa   : > { %v4145_v58 = vpop.eup %4144  ;;  %v2702_v30 = vmul.f32 %v4143_v34, %v5132_v57  ;;  %v2447_v35 = vmul.f32 %v5098_v26, %v2408_v53 }
 0x3ab   : > { %v2350_v10 = vadd.f32 1e-05, %v2318_v29  ;;  %v2610_v21 = vadd.f32 1.0, %v4145_v58  ;;  %v5192_v44 = vadd.f32 %v5101_v22, %v2448_v50 }
 0x3ac   : > { %v4147_v5 = vpop.eup %4146  ;;  %v2279_v52 = vpop.xlane.xlu1 %2278  ;;  %v5198_v23 = vadd.f32 %v5101_v22, %v2447_v35 }
 0x3ad   : > { %v4149_v63 = vpop.eup %4148  ;;  %4166 = vrsqrt.f32 %v2350_v10  ;;  %v2319_v15 = vmul.f32 0.03125, %v2279_v52  ;;  %v2611_v0 = vadd.f32 1.0, %v4147_v5  ;;  %v3382_v60 = vmul.f32 -1.442695, %v5192_v44  ;;  %v3831_v10 = vld [vmem:[%s5087_s16 + $0x10] sm:$0xff]  }
 0x3ae   : > { %v4151_v8 = vpop.eup %4150  ;;  %v2703_v43 = vmul.f32 %v4149_v63, %v5137_v47  ;;  %4168 = vrcp.f32 %v2610_v21  ;;  %v3381_v50 = vmul.f32 -1.442695, %v5198_v23  ;;  %3580 = vmatprep.subr.bf16.mxu1 %v3831_v10 }
 0x3af   : > { %v2351_v61 = vadd.f32 1e-05, %v2319_v15  ;;  %4170 = vrcp.f32 %v2611_v0  ;;  %v2411_v18 = vmul.f32 %v4151_v8, %v4981_v19  ;;  %v4153_v3 = vpop.eup %4152  ;;  %3581 = vmatpush3.bf16.msra.mxu1 %v3831_v10 }
 0x3b0   : > { %v2282_v28 = vpop.xlane.xlu0 %2281  ;;  %v3652_v11 = vpack.i.bf16 %v2703_v43, %v2702_v30  ;;  %v2410_v4 = vmul.f32 %v4153_v3, %v4975_v49 }
 0x3b1   : > { %v4155_v16 = vpop.eup %4154  ;;  %4172 = vrsqrt.f32 %v2351_v61  ;;  %v2320_v33 = vmul.f32 0.03125, %v2282_v28  ;;  %v2450_v57 = vmul.f32 %v5098_v26, %v2411_v18 }
 0x3b2   : > { %v4157_v46 = vpop.eup %4156  ;;  %3653 = vrot.lane.b32.xlu0 %v3652_v11, %s4306_s27 }
 0x3b3   : > { %v4159_v47 = vpop.eup %4158  ;;  %v2352_v17 = vadd.f32 1e-05, %v2320_v33  ;;  %v2412_v19 = vmul.f32 %v4157_v46, %v4987_v48  ;;  %v2704_v48 = vmul.f32 %v4155_v16, %v5144_v25  ;;  %v5206_v58 = vadd.f32 %v5101_v22, %v2450_v57 }
 0x3b4   : > { %v4161_v40 = vpop.eup %4160  ;;  %v2285_v2 = vpop.xlane.xlu1 %2284  ;;  %v2612_v51 = vadd.f32 1.0, %v4159_v47  ;;  %v3832_v47 = vld [vmem:[%s5087_s16 + $0x8] sm:$0xff]  }
 0x3b5   : > { %v4163_v55 = vpop.eup %4162  ;;  %4174 = vrsqrt.f32 %v2352_v17  ;;  %v2321_v12 = vmul.f32 0.03125, %v2285_v2  ;;  %v2613_v13 = vadd.f32 1.0, %v4161_v40  ;;  %v2451_v45 = vmul.f32 %v5098_v26, %v2412_v19  ;;  %3582 = vmatprep.subr.bf16.mxu1 %v3832_v47 }
 0x3b6   : > { %v4165_v29 = vpop.eup %4164  ;;  %v2705_v34 = vmul.f32 %v4163_v55, %v5149_v6  ;;  %4176 = vrcp.f32 %v2612_v51  ;;  %v3384_v0 = vmul.f32 -1.442695, %v5206_v58  ;;  %3583 = vmatpush3.bf16.msra.mxu1 %v3832_v47 }
 0x3b7   : > { %v2353_v5 = vadd.f32 1e-05, %v2321_v12  ;;  %4178 = vrcp.f32 %v2613_v13  ;;  %v2413_v49 = vmul.f32 %v4165_v29, %v4993_v1  ;;  %v5211_v52 = vadd.f32 %v5101_v22, %v2451_v45 }
 0x3b8   : > { %v2288_v21 = vpop.xlane.xlu0 %2287  ;;  %v3657_v53 = vpack.i.bf16 %v2705_v34, %v2704_v48  ;;  %4180 = vpow2.f32 %v3382_v60  ;;  %v2449_v1 = vmul.f32 %v5098_v26, %v2410_v4 }
 0x3b9   : > { %4182 = vrsqrt.f32 %v2353_v5  ;;  %v2322_v25 = vmul.f32 0.03125, %v2288_v21  ;;  %v2452_v6 = vmul.f32 %v5098_v26, %v2413_v49  ;;  %v3385_v63 = vmul.f32 -1.442695, %v5211_v52 }
 0x3ba   : > { %v4167_v15 = vpop.eup %4166  ;;  %3658 = vrot.lane.b32.xlu1 %v3657_v53, %s4306_s27  ;;  %v5228_v57 = vadd.f32 %v5101_v22, %v2449_v1 }
 0x3bb   : > { %v4169_v8 = vpop.eup %4168  ;;  %v2354_v30 = vadd.f32 1e-05, %v2322_v25  ;;  %v5220_v43 = vadd.f32 %v5101_v22, %v2452_v6  ;;  %4184 = vpow2.f32 %v3385_v63  ;;  %v2414_v61 = vmul.f32 %v4167_v15, %v4999_v41 }
 0x3bc   : > { %v4171_v18 = vpop.eup %4170  ;;  %v2291_v3 = vpop.xlane.xlu1 %2290  ;;  %4186 = vpow2.f32 %v3381_v50  ;;  %v2706_v11 = vmul.f32 %v4169_v8, %v5157_v9  ;;  %v3383_v51 = vmul.f32 -1.442695, %v5228_v57 }
 0x3bd   : > { %4188 = vrsqrt.f32 %v2354_v30  ;;  %v2323_v28 = vmul.f32 0.03125, %v2291_v3  ;;  %v2707_v35 = vmul.f32 %v4171_v18, %v5162_v31  ;;  %v3386_v33 = vmul.f32 -1.442695, %v5220_v43 }
 0x3be   : > { %v4173_v16 = vpop.eup %4172  ;;  %v2453_v46 = vmul.f32 %v5098_v26, %v2414_v61  ;;  %4190 = vpow2.f32 %v3384_v0 }
 0x3bf   : > { %v2355_v17 = vadd.f32 1e-05, %v2323_v28  ;;  %v3662_v41 = vpack.i.bf16 %v2707_v35, %v2706_v11  ;;  %v2415_v19 = vmul.f32 %v4173_v16, %v5005_v38  ;;  %4192 = vpow2.f32 %v3386_v33 }
 0x3c0   : > { %v5233_v40 = vadd.f32 %v5101_v22, %v2453_v46 }
 0x3c1   : > { %4194 = vrsqrt.f32 %v2355_v17  ;;  %3663 = vrot.lane.b32.xlu1 %v3662_v41, %s4307_s28  ;;  %v2454_v9 = vmul.f32 %v5098_v26, %v2415_v19 }
 0x3c2   : > { %v4175_v31 = vpop.eup %4174  ;;  %v3387_v2 = vmul.f32 -1.442695, %v5233_v40 }
 0x3c3   : > { %v4177_v60 = vpop.eup %4176  ;;  %v5240_v38 = vadd.f32 %v5101_v22, %v2454_v9  ;;  %v2416_v55 = vmul.f32 %v4175_v31, %v5011_v62  ;;  %v3833_v31 = vld [vmem:[%s5087_s16] sm:$0xff]  }
 0x3c4   : > { %v4179_v4 = vpop.eup %4178  ;;  %4196 = vpow2.f32 %v3387_v2  ;;  %v2708_v13 = vmul.f32 %v4177_v60, %v5171_v59  ;;  %3584 = vmatprep.subr.bf16.mxu1 %v3833_v31 }
 0x3c5   : > { %v4181_v12 = vpop.eup %4180  ;;  %v2709_v45 = vmul.f32 %v4179_v4, %v5177_v54  ;;  %v3388_v48 = vmul.f32 -1.442695, %v5240_v38  ;;  %4198 = vpow2.f32 %v3383_v51  ;;  %v2455_v34 = vmul.f32 %v5098_v26, %v2416_v55  ;;  %3585 = vmatpush3.bf16.msra.mxu1 %v3833_v31 }
 0x3c6   : > { %v4183_v29 = vpop.eup %4182  ;;  %v2615_v59 = vadd.f32 1.0, %v4181_v12 }
 0x3c7   : > { %v3667_v10 = vpack.i.bf16 %v2709_v45, %v2708_v13  ;;  %4200 = vpow2.f32 %v3388_v48  ;;  %v2417_v49 = vmul.f32 %v4183_v29, %v5017_v14  ;;  %v5249_v21 = vadd.f32 %v5101_v22, %v2455_v34 }
 0x3c8   : > { %v4185_v5 = vpop.eup %4184  ;;  %4202 = vrcp.f32 %v2615_v59 }
 0x3c9   : > { %v4187_v62 = vpop.eup %4186  ;;  %3668 = vrot.lane.b32.xlu1 %v3667_v10, %s4307_s28  ;;  %v2618_v54 = vadd.f32 1.0, %v4185_v5  ;;  %v2456_v50 = vmul.f32 %v5098_v26, %v2417_v49  ;;  %v3389_v25 = vmul.f32 -1.442695, %v5249_v21 }
 0x3ca   : > { %v4189_v53 = vpop.eup %4188  ;;  %v2614_v1 = vadd.f32 1.0, %v4187_v62 }
 0x3cb   : > { %v2418_v6 = vmul.f32 %v4189_v53, %v5023_v37  ;;  %v4191_v63 = vpop.eup %4190  ;;  %v5256_v15 = vadd.f32 %v5101_v22, %v2456_v50  ;;  %4204 = vrcp.f32 %v2618_v54 }
 0x3cc   : > { %v4193_v14 = vpop.eup %4192  ;;  %4206 = vpow2.f32 %v3389_v25  ;;  %v2617_v28 = vadd.f32 1.0, %v4191_v63 }
 0x3cd   : > { %v2457_v0 = vmul.f32 %v5098_v26, %v2418_v6  ;;  %v2619_v30 = vadd.f32 1.0, %v4193_v14  ;;  %v3390_v61 = vmul.f32 -1.442695, %v5256_v15 }
 0x3ce   : > { %v4195_v8 = vpop.eup %4194 }
 0x3cf   : > { %v2419_v18 = vmul.f32 %v4195_v8, %v5029_v39  ;;  %v5262_v3 = vadd.f32 %v5101_v22, %v2457_v0  ;;  %4208 = vrcp.f32 %v2619_v30 }
 0x3d0   : > { %4210 = vrcp.f32 %v2614_v1 }
 0x3d1   : > { %v4197_v37 = vpop.eup %4196  ;;  %v2458_v11 = vmul.f32 %v5098_v26, %v2419_v18  ;;  %v3391_v35 = vmul.f32 -1.442695, %v5262_v3  ;;  %4212 = vpow2.f32 %v3390_v61 }
 0x3d2   : > { %v2620_v16 = vadd.f32 1.0, %v4197_v37  ;;  %v4199_v33 = vpop.eup %4198  ;;  %v2201_v37 = vpop.xlane.xlu1 %2200 }
 0x3d3   : > { %v2497_v46 = vadd.f32 %v5101_v22, %v2458_v11  ;;  %4214 = vpow2.f32 %v3391_v35  ;;  %v2616_v41 = vadd.f32 1.0, %v4199_v33  ;;  %v2293_v11 = vmul.f32 0.03125, %v2201_v37 }
 0x3d4   : > { %v4201_v47 = vpop.eup %4200  ;;  %4216 = vrcp.f32 %v2617_v28 }
 0x3d5   : > { %v3392_v39 = vmul.f32 -1.442695, %v2497_v46  ;;  %v2621_v17 = vadd.f32 1.0, %v4201_v47  ;;  %4218 = vrcp.f32 %v2620_v16  ;;  %v4203_v19 = vpop.eup %4202  ;;  %v2325_v16 = vadd.f32 1e-05, %v2293_v11 }
 0x3d6   : > { %v2711_v48 = vmul.f32 %v4203_v19, %v5192_v44  ;;  %v2207_v33 = vpop.xlane.xlu1 %2206 }
 0x3d7   : > { %4220 = vpow2.f32 %v3392_v39  ;;  %v2295_v47 = vmul.f32 0.03125, %v2207_v33 }
 0x3d8   : > { %4222 = vrcp.f32 %v2621_v17  ;;  %v4205_v9 = vpop.eup %4204 }
 0x3d9   : > { %4224 = vrcp.f32 %v2616_v41  ;;  %v4207_v2 = vpop.eup %4206  ;;  %v2714_v55 = vmul.f32 %v4205_v9, %v5211_v52  ;;  %v2327_v17 = vadd.f32 1e-05, %v2295_v47 }
 0x3da   : > { %v2622_v60 = vadd.f32 1.0, %v4207_v2 }
 0x3dc   : > { %v4209_v51 = vpop.eup %4208  ;;  %4226 = vrcp.f32 %v2622_v60 }
 0x3dd   : > { %v4211_v4 = vpop.eup %4210  ;;  %v2715_v12 = vmul.f32 %v4209_v51, %v5220_v43 }
 0x3de   : > { %v4213_v13 = vpop.eup %4212  ;;  %v2710_v49 = vmul.f32 %v4211_v4, %v5198_v23 }
 0x3df   : > { %v3672_v29 = vpack.i.bf16 %v2715_v12, %v2714_v55  ;;  %v2623_v34 = vadd.f32 1.0, %v4213_v13 }
 0x3e0   : > { %v4215_v45 = vpop.eup %4214  ;;  %v3677_v59 = vpack.i.bf16 %v2711_v48, %v2710_v49 }
 0x3e1   : > { %v2624_v10 = vadd.f32 1.0, %v4215_v45  ;;  %v4217_v5 = vpop.eup %4216  ;;  %3673 = vrot.lane.b32.xlu0 %v3672_v29, %s4308_s29  ;;  %4228 = vrcp.f32 %v2623_v34 }
 0x3e2   : > { %v4219_v62 = vpop.eup %4218  ;;  %v2713_v6 = vmul.f32 %v4217_v5, %v5206_v58 }
 0x3e3   : > { %4230 = vrcp.f32 %v2624_v10  ;;  %v2716_v44 = vmul.f32 %v4219_v62, %v5233_v40 }
 0x3e4   : > { %v4221_v52 = vpop.eup %4220 }
 0x3e5   : > { %v4223_v43 = vpop.eup %4222  ;;  %v2625_v53 = vadd.f32 1.0, %v4221_v52  ;;  %3678 = vrot.lane.b32.xlu0 %v3677_v59, %s4307_s28 }
 0x3e6   : > { %v2717_v54 = vmul.f32 %v4223_v43, %v5240_v38  ;;  %v4225_v50 = vpop.eup %4224 }
 0x3e7   : > { %4232 = vrcp.f32 %v2625_v53  ;;  %v2712_v23 = vmul.f32 %v4225_v50, %v5228_v57  ;;  %v2198_v57 = vpop.xlane.xlu0 %2197 }
 0x3e8   : > { %v3682_v25 = vpack.i.bf16 %v2717_v54, %v2716_v44  ;;  %v2292_v28 = vmul.f32 0.03125, %v2198_v57 }
 0x3e9   : > { %v3687_v63 = vpack.i.bf16 %v2713_v6, %v2712_v23  ;;  %v4227_v14 = vpop.eup %4226 }
 0x3ea   : > { %3683 = vrot.lane.b32.xlu1 %v3682_v25, %s4308_s29  ;;  %v2718_v0 = vmul.f32 %v4227_v14, %v5249_v21  ;;  %v2324_v35 = vadd.f32 1e-05, %v2292_v28 }
 0x3eb   : > { %v2204_v21 = vpop.xlane.xlu0 %2203 }
 0x3ec   : > { %4234 = vrsqrt.f32 %v2324_v35 }
 0x3ed   : > { %4236 = vrsqrt.f32 %v2325_v16 }
 0x3ee   : > { %3688 = vrot.lane.b32.xlu1 %v3687_v63, %s4307_s28  ;;  %v4229_v1 = vpop.eup %4228 }
 0x3ef   : > { %v2719_v40 = vmul.f32 %v4229_v1, %v5256_v15  ;;  %v2294_v15 = vmul.f32 0.03125, %v2204_v21  ;;  %v2210_v41 = vpop.xlane.xlu0 %2209 }
 0x3f0   : > { %v4231_v8 = vpop.eup %4230 }
 0x3f1   : > { %v3692_v38 = vpack.i.bf16 %v2719_v40, %v2718_v0  ;;  %v2720_v58 = vmul.f32 %v4231_v8, %v5262_v3  ;;  %v2326_v39 = vadd.f32 1e-05, %v2294_v15  ;;  %v2213_v3 = vpop.xlane.xlu1 %2212 }
 0x3f2   : > { %v2297_v19 = vmul.f32 0.03125, %v2213_v3 }
 0x3f3   : > { %3693 = vrot.lane.b32.xlu0 %v3692_v38, %s4308_s29  ;;  %4238 = vrsqrt.f32 %v2326_v39  ;;  %v2216_v9 = vpop.xlane.xlu0 %2215 }
 0x3f4   : > { %v4233_v30 = vpop.eup %4232  ;;  %4240 = vrsqrt.f32 %v2327_v17  ;;  %v2329_v4 = vadd.f32 1e-05, %v2297_v19  ;;  %v2298_v55 = vmul.f32 0.03125, %v2216_v9 }
 0x3f5   : > { %v2721_v61 = vmul.f32 %v4233_v30, %v2497_v46  ;;  %v2296_v46 = vmul.f32 0.03125, %v2210_v41  ;;  %v2219_v51 = vpop.xlane.xlu1 %2218 }
 0x3f6   : > { %v2299_v13 = vmul.f32 0.03125, %v2219_v51  ;;  %v2330_v29 = vadd.f32 1e-05, %v2298_v55 }
 0x3f7   : > { %v3697_v18 = vpack.i.bf16 %v2721_v61, %v2720_v58  ;;  %v2328_v2 = vadd.f32 1e-05, %v2296_v46 }
 0x3f8   : > { %v2331_v48 = vadd.f32 1e-05, %v2299_v13 }
 0x3f9   : > { %3698 = vrot.lane.b32.xlu1 %v3697_v18, %s4308_s29  ;;  %v4235_v31 = vpop.eup %4234  ;;  %4242 = vrsqrt.f32 %v2328_v2 }
 0x3fa   : > { %v4237_v60 = vpop.eup %4236  ;;  %v2388_v12 = vmul.f32 %v4235_v31, %v5032_v20  ;;  %4244 = vrsqrt.f32 %v2329_v4 }
 0x3fb   : > { %v2389_v45 = vmul.f32 %v4237_v60, %v5040_v56  ;;  %4246 = vrsqrt.f32 %v2330_v29 }
 0x3fc   : > { %v2427_v34 = vmul.f32 %v5098_v26, %v2388_v12  ;;  %4248 = vrsqrt.f32 %v2331_v48 }
 0x3fd   : > { %v2428_v5 = vmul.f32 %v5098_v26, %v2389_v45 }
 0x3fe   : > { %v5291_v52 = vadd.f32 %v5101_v22, %v2427_v34 }
 0x3ff   : > { %v5295_v56 = vadd.f32 %v5101_v22, %v2428_v5 }
 0x400   : > { %v4239_v10 = vpop.eup %4238  ;;  %v3361_v59 = vmul.f32 -1.442695, %v5291_v52 }
 0x401   : > { %v4241_v49 = vpop.eup %4240  ;;  %v2390_v62 = vmul.f32 %v4239_v10, %v5043_v32  ;;  %v3362_v53 = vmul.f32 -1.442695, %v5295_v56 }
 0x402   : > { %v2391_v20 = vmul.f32 %v4241_v49, %v5052_v7  ;;  %4250 = vpow2.f32 %v3361_v59 }
 0x403   : > { %v2429_v43 = vmul.f32 %v5098_v26, %v2390_v62  ;;  %4252 = vpow2.f32 %v3362_v53 }
 0x404   : > { %v2430_v44 = vmul.f32 %v5098_v26, %v2391_v20 }
 0x405   : > { %v5302_v32 = vadd.f32 %v5101_v22, %v2429_v43 }
 0x406   : > { %v4243_v54 = vpop.eup %4242  ;;  %v5306_v7 = vadd.f32 %v5101_v22, %v2430_v44 }
 0x407   : > { %v4245_v50 = vpop.eup %4244  ;;  %v2392_v25 = vmul.f32 %v4243_v54, %v5055_v27  ;;  %v3363_v63 = vmul.f32 -1.442695, %v5302_v32 }
 0x408   : > { %v2393_v6 = vmul.f32 %v4245_v50, %v5064_v42  ;;  %v4247_v23 = vpop.eup %4246  ;;  %v3364_v1 = vmul.f32 -1.442695, %v5306_v7 }
 0x409   : > { %v4249_v14 = vpop.eup %4248  ;;  %v2431_v0 = vmul.f32 %v5098_v26, %v2392_v25  ;;  %v2394_v40 = vmul.f32 %v4247_v23, %v5067_v36  ;;  %4254 = vpow2.f32 %v3363_v63 }
 0x40a   : > { %v2432_v8 = vmul.f32 %v5098_v26, %v2393_v6  ;;  %v2395_v27 = vmul.f32 %v4249_v14, %v5076_v24  ;;  %4256 = vpow2.f32 %v3364_v1 }
 0x40b   : > { %v5316_v38 = vadd.f32 %v5101_v22, %v2431_v0  ;;  %v2433_v30 = vmul.f32 %v5098_v26, %v2394_v40 }
 0x40c   : > { %v5319_v42 = vadd.f32 %v5101_v22, %v2432_v8  ;;  %v2434_v58 = vmul.f32 %v5098_v26, %v2395_v27 }
 0x40d   : > { %v3365_v18 = vmul.f32 -1.442695, %v5316_v38  ;;  %v5326_v24 = vadd.f32 %v5101_v22, %v2433_v30 }
 0x40e   : > { %v3366_v57 = vmul.f32 -1.442695, %v5319_v42  ;;  %v5329_v28 = vadd.f32 %v5101_v22, %v2434_v58 }
 0x40f   : > { %v4251_v61 = vpop.eup %4250  ;;  %4258 = vpow2.f32 %v3365_v18  ;;  %v3367_v35 = vmul.f32 -1.442695, %v5326_v24 }
 0x410   : > { %v4253_v36 = vpop.eup %4252  ;;  %v2594_v37 = vadd.f32 1.0, %v4251_v61  ;;  %4260 = vpow2.f32 %v3366_v57  ;;  %v3368_v26 = vmul.f32 -1.442695, %v5329_v28 }
 0x411   : > { %v2595_v11 = vadd.f32 1.0, %v4253_v36 }
 0x412   : > { %4262 = vrcp.f32 %v2594_v37 }
 0x413   : > { %4264 = vrcp.f32 %v2595_v11  ;;  %v3644_v17 = vpop.permute.xlu0 %3643 }
 0x414   : > { %4266 = vpow2.f32 %v3367_v35  ;;  %v3646_v60 = vunpack.i.h.bf16 %v3644_v17  ;;  %v3645_v4 = vunpack.i.l.bf16 %v3644_v17 }
 0x415   : > { %4268 = vpow2.f32 %v3368_v26 }
 0x416   : > { %v4255_v16 = vpop.eup %4254 }
 0x417   : > { %v4257_v21 = vpop.eup %4256  ;;  %v2596_v33 = vadd.f32 1.0, %v4255_v16 }
 0x418   : > { %v2597_v15 = vadd.f32 1.0, %v4257_v21 }
 0x419   : > { %4270 = vrcp.f32 %v2596_v33 }
 0x41a   : > { %4272 = vrcp.f32 %v2597_v15 }
 0x41b   : > { %v3649_v47 = vpop.permute.xlu1 %3648 }
 0x41c   : > { %v4259_v39 = vpop.eup %4258  ;;  %v3651_v25 = vunpack.i.h.bf16 %v3649_v47  ;;  %v3650_v6 = vunpack.i.l.bf16 %v3649_v47 }
 0x41d   : > { %v4261_v41 = vpop.eup %4260  ;;  %v2598_v46 = vadd.f32 1.0, %v4259_v39 }
 0x41e   : > { %v2599_v31 = vadd.f32 1.0, %v4261_v41 }
 0x41f   : > { %v4263_v3 = vpop.eup %4262  ;;  %4274 = vrcp.f32 %v2598_v46 }
 0x420   : > { %v4265_v9 = vpop.eup %4264  ;;  %v2690_v45 = vmul.f32 %v4263_v3, %v5291_v52  ;;  %4276 = vrcp.f32 %v2599_v31 }
 0x421   : > { %v4267_v51 = vpop.eup %4266  ;;  %v2691_v29 = vmul.f32 %v4265_v9, %v5295_v56 }
 0x422   : > { %v4269_v13 = vpop.eup %4268  ;;  %v2600_v48 = vadd.f32 1.0, %v4267_v51  ;;  %v2818_v5 = vsel %vm799_vm0, %v2690_v45, %v3645_v4 }
 0x423   : > { %v2819_v10 = vsel %vm799_vm0, %v2691_v29, %v3646_v60  ;;  %v2601_v20 = vadd.f32 1.0, %v4269_v13 }
 0x424   : > { %v5335_v2 = vpop.permute.xlu0 %3653  ;;  %4278 = vrcp.f32 %v2600_v48 }
 0x425   : > { %4280 = vrcp.f32 %v2601_v20  ;;  %v3655_v35 = vunpack.i.l.bf16 %v5335_v2 }
 0x426   : > { %v4271_v52 = vpop.eup %4270 }
 0x427   : > { %v4273_v54 = vpop.eup %4272  ;;  %v2692_v1 = vmul.f32 %v4271_v52, %v5302_v32  ;;  %v3656_v32 = vunpack.i.h.bf16 %v5335_v2 }
 0x428   : > { %v2693_v14 = vmul.f32 %v4273_v54, %v5306_v7 }
 0x429   : > { %v2820_v8 = vsel %vm799_vm0, %v2692_v1, %v3650_v6 }
 0x42a   : > { %v2821_v40 = vsel %vm799_vm0, %v2693_v14, %v3651_v25 }
 0x42c   : > { %v5333_v22 = vpop.permute.xlu1 %3658  ;;  %v4275_v57 = vpop.eup %4274 }
 0x42d   : > { %v4277_v7 = vpop.eup %4276  ;;  %v2694_v21 = vmul.f32 %v4275_v57, %v5316_v38  ;;  %v3661_v9 = vunpack.i.h.bf16 %v5333_v22  ;;  %v3660_v31 = vunpack.i.l.bf16 %v5333_v22 }
 0x42e   : > { %v2695_v33 = vmul.f32 %v4277_v7, %v5319_v42 }
 0x42f   : > { %v2822_v3 = vsel %vm799_vm0, %v2694_v21, %v3655_v35 }
 0x430   : > { %v2823_v41 = vsel %vm799_vm0, %v2695_v33, %v3656_v32 }
 0x431   : > { %v4279_v15 = vpop.eup %4278 }
 0x432   : > { %v4281_v17 = vpop.eup %4280 }
 0x433   : > { %v3664_v19 = vpop.permute.xlu1 %3663 }
 0x434   : > { %v3666_v55 = vunpack.i.h.bf16 %v3664_v19  ;;  %v3665_v12 = vunpack.i.l.bf16 %v3664_v19 }
 0x436   : > { %v2827_v59 = vsel %vm2826_vm1, %v2818_v5, %v3665_v12  ;;  %v2828_v43 = vsel %vm2826_vm1, %v2819_v10, %v3666_v55  ;;  %v2697_v55 = vmul.f32 %v4281_v17, %v5329_v28  ;;  %v2696_v12 = vmul.f32 %v4279_v15, %v5326_v24 }
 0x438   : > { %v2825_v29 = vsel %vm799_vm0, %v2697_v55, %v3661_v9  ;;  %v2824_v22 = vsel %vm799_vm0, %v2696_v12, %v3660_v31 }
 0x43b   : > { %v3669_v53 = vpop.permute.xlu1 %3668 }
 0x43c   : > { %v3671_v23 = vunpack.i.h.bf16 %v3669_v53  ;;  %v3670_v63 = vunpack.i.l.bf16 %v3669_v53 }
 0x43e   : > { %v2830_v58 = vsel %vm2826_vm1, %v2821_v40, %v3671_v23  ;;  %v2829_v61 = vsel %vm2826_vm1, %v2820_v8, %v3670_v63 }
 0x453   : > { %v3674_v34 = vpop.permute.xlu0 %3673 }
 0x454   : > { %v3676_v49 = vunpack.i.h.bf16 %v3674_v34  ;;  %v3675_v62 = vunpack.i.l.bf16 %v3674_v34 }
 0x456   : > { %v2836_v56 = vsel %vm2835_vm2, %v2827_v59, %v3675_v62  ;;  %v2837_v44 = vsel %vm2835_vm2, %v2828_v43, %v3676_v49 }
 0x457   : > { %v2844_v50 = vpack.c.bf16 %v2837_v44, %v2836_v56  ;;  %v3679_v11 = vpop.permute.xlu0 %3678 }
 0x458   : > { %v3681_v26 = vunpack.i.h.bf16 %v3679_v11  ;;  %v3680_v16 = vunpack.i.l.bf16 %v3679_v11 }
 0x459   : > { %3586 = vmatprep.mubr.bf16.mxu1 %v2844_v50 }
 0x45a   : > { %v2831_v2 = vsel %vm2826_vm1, %v2822_v3, %v3680_v16  ;;  %v2832_v38 = vsel %vm2826_vm1, %v2823_v41, %v3681_v26 }
 0x45c   : > { %v3684_v0 = vpop.permute.xlu1 %3683 }
 0x45d   : > { %v3686_v27 = vunpack.i.h.bf16 %v3684_v0  ;;  %v3685_v30 = vunpack.i.l.bf16 %v3684_v0 }
 0x45f   : > { %v2839_v18 = vsel %vm2835_vm2, %v2830_v58, %v3686_v27  ;;  %v2838_v36 = vsel %vm2835_vm2, %v2829_v61, %v3685_v30 }
 0x460   : > { %v2845_v37 = vpack.c.bf16 %v2839_v18, %v2838_v36  ;;  %v3689_v47 = vpop.permute.xlu1 %3688 }
 0x461   : > { %v3691_v51 = vunpack.i.h.bf16 %v3689_v47  ;;  %v3690_v42 = vunpack.i.l.bf16 %v3689_v47 }
 0x462   : > { %3587 = vmatmul.mubr.bf16.vlgmr.msra.gmra.mxu1 %v2845_v37 }
 0x463   : > { %v2834_v10 = vsel %vm2826_vm1, %v2825_v29, %v3691_v51  ;;  %v2833_v5 = vsel %vm2826_vm1, %v2824_v22, %v3690_v42 }
 0x465   : > { %v3694_v39 = vpop.permute.xlu0 %3693 }
 0x466   : > { %v3696_v46 = vunpack.i.h.bf16 %v3694_v39  ;;  %v3695_v19 = vunpack.i.l.bf16 %v3694_v39 }
 0x468   : > { %v2840_v60 = vsel %vm2835_vm2, %v2831_v2, %v3695_v19  ;;  %v2841_v4 = vsel %vm2835_vm2, %v2832_v38, %v3696_v46 }
 0x469   : > { %v2846_v13 = vpack.c.bf16 %v2841_v4, %v2840_v60 }
 0x46b   : > { %v3699_v45 = vpop.permute.xlu1 %3698  ;;  %3590 = vmatprep.mubr.bf16.mxu1 %v2846_v13 }
 0x46c   : > { %v3701_v48 = vunpack.i.h.bf16 %v3699_v45  ;;  %v3700_v34 = vunpack.i.l.bf16 %v3699_v45 }
 0x46e   : > { %v2842_v49 = vsel %vm2835_vm2, %v2833_v5, %v3700_v34  ;;  %v2843_v28 = vsel %vm2835_vm2, %v2834_v10, %v3701_v48 }
 0x46f   : > { %v2847_v62 = vpack.c.bf16 %v2843_v28, %v2842_v49 }
 0x471   : > { %3591 = vmatmul.mubr.bf16.gmra.mxu1 %v2847_v62 }
 0x522   : > { %v3588_v24 = vpop.f32.mrf.mxu1 }
 0x524   : > { %v2946_v20 = vpop.f32.mrf.mxu1 }
 0x526   : > { %v3589_v59 = vpop.f32.mrf.mxu1 }
 0x527   : > { %v3431_v43 = vpack.c.bf16 %v3589_v59, %v3588_v24 }
 0x528   : > { %v2949_v52 = vpop.f32.mrf.mxu1 }
 0x529   : > { %3443 = vst [vmem:[%s380_s9 + $0x8] sm:$0xff] %v3431_v43   ;;  %v3426_v53 = vpack.c.bf16 %v2949_v52, %v2946_v20 }
 0x52b   : > { %3427 = vst [vmem:[%s380_s9] sm:$0xff] %v3426_v53  }
 0x531   : > { %v3592_v56 = vpop.f32.mrf.mxu1 }
 0x533   : > { %v2962_v44 = vpop.f32.mrf.mxu1 }
 0x535   : > { %v3593_v54 = vpop.f32.mrf.mxu1 }
 0x536   : > { %v3441_v50 = vpack.c.bf16 %v3593_v54, %v3592_v56 }
 0x537   : > { %v2965_v25 = vpop.f32.mrf.mxu1 }
 0x538   : > { %3445 = vst [vmem:[%s380_s9 + $0x18] sm:$0xff] %v3441_v50   ;;  %v3436_v6 = vpack.c.bf16 %v2965_v25, %v2962_v44 }
 0x53a   : > { %3444 = vst [vmem:[%s380_s9 + $0x10] sm:$0xff] %v3436_v6  }
 0x53b PF: > { %s16_s23 = sadd.s32 1, %s4304_s23   ;;  %s5403_s21 = smov %s4300_s22 }
 0x53c   : > { %p13_p5 = scmp.ge.s32.totalorder %s16_s23, 4   ;;  %s5404_s22 = smov %s5406_s24 }
 0x53e   :  { %15 = sbr.rel (!%p13_p5) target bundleno = 2 (0x2), region = 89 }

</bundles_post_ra>
